<compile_context>
chip_gen: v5e
topology: v5e:2x2
jax: 0.10.0
libtpu: 0.0.40
codegen_flags: <defaults>
</compile_context>

<pallas_src>
import math
from functools import partial

import jax
import jax.numpy as jnp
from jax.experimental import pallas as pl
from jax.experimental.pallas import tpu as pltpu

LN_EPS = 1e-5  # PyTorch nn.LayerNorm default


# ----------------------------- in-kernel helpers -----------------------------

def _layernorm(x, gamma, beta):
    # f32 statistics (keep LN math in f32 even though matmuls are bf16).
    mu = jnp.mean(x, axis=-1, keepdims=True)
    var = jnp.mean((x - mu) ** 2, axis=-1, keepdims=True)
    return (x - mu) * jax.lax.rsqrt(var + LN_EPS) * gamma + beta


def _gelu(x):
    # GPT-2 "gelu_new" (tanh approximation), f32 on the VPU/EUP.
    return 0.5 * x * (1.0 + jnp.tanh(0.7978845608028654 * (x + 0.044715 * x * x * x)))


def _mm(a, b):
    # bf16 MXU inputs, f32 accumulation.
    return jnp.dot(a.astype(jnp.bfloat16), b, preferred_element_type=jnp.float32)


# ----------------------------- Pallas kernel ---------------------------------

def gpt2_stack_kernel(x_ref,
                      ln1g_ref, ln1b_ref,
                      wq_ref, wk_ref, wv_ref,
                      bq_ref, bk_ref, bv_ref,
                      wo_ref, bo_ref,
                      ln2g_ref, ln2b_ref,
                      wfc_ref, bfc_ref, wout_ref, bout_ref,
                      lnfg_ref, lnfb_ref, whead_ref,
                      logits_ref,
                      res_ref, *, n_heads):
    """All L transformer blocks + final LN + head for one batch element.

    grid = (B, L): the residual stream lives in the VMEM scratch `res_ref`
    across the "arbitrary" layer axis; per-layer weight blocks are indexed by
    l and pipelined.  Logits are written only at the last layer step."""
    l = pl.program_id(1)
    n_layers = pl.num_programs(1)
    bf16 = jnp.bfloat16

    # Layer 0: seed the resident residual stream with the embeddings.
    @pl.when(l == 0)
    def _():
        res_ref[...] = x_ref[0]

    x = res_ref[...]                    # (T, D) f32 residual stream
    T, D = x.shape
    H = n_heads
    hd = D // H
    scale = 1.0 / math.sqrt(hd)

    # ---------------- attention sub-layer (head-batched) ----------------
    h = _layernorm(x, ln1g_ref[0], ln1b_ref[0])                 # (T, D) f32
    hb = jnp.broadcast_to(h.astype(bf16)[None], (H, T, D))      # (H, T, D) bf16

    # Head-major projection weights -> Q/K/V directly in (H, T, hd) layout
    # (no lane-dim slicing, no per-head loop, no concat).
    q = jnp.einsum('htd,hdk->htk', hb, wq_ref[0],
                   preferred_element_type=jnp.float32) + bq_ref[0]
    k = jnp.einsum('htd,hdk->htk', hb, wk_ref[0],
                   preferred_element_type=jnp.float32) + bk_ref[0]
    v = jnp.einsum('htd,hdk->htk', hb, wv_ref[0],
                   preferred_element_type=jnp.float32) + bv_ref[0]
    q = q * scale                                               # fold 1/sqrt(hd) into Q

    # causal additive mask (T, T), broadcast over heads
    row = jax.lax.broadcasted_iota(jnp.int32, (T, T), 0)
    col = jax.lax.broadcasted_iota(jnp.int32, (T, T), 1)
    neg_mask = jnp.where(col <= row, 0.0, -1e30).astype(jnp.float32)

    # TODO(synk): for large T, replace the full (H, T, T) score matrix with a
    # flash-style online softmax over KV tiles; full-T attention is fine at demo scale.
    s = jnp.einsum('hqd,hkd->hqk', q.astype(bf16), k.astype(bf16),
                   preferred_element_type=jnp.float32)          # (H, T, T) f32
    s = s + neg_mask[None]
    s = s - jnp.max(s, axis=-1, keepdims=True)
    p = jnp.exp(s)
    p = p * pl.reciprocal(jnp.sum(p, axis=-1, keepdims=True), approx=True)

    o = jnp.einsum('hqk,hkd->hqd', p.astype(bf16), v.astype(bf16),
                   preferred_element_type=jnp.float32)          # (H, T, hd) f32

    # head-batched output projection, then sum over heads (== concat @ W_proj)
    attn = jnp.einsum('htd,hdk->htk', o.astype(bf16), wo_ref[0],
                      preferred_element_type=jnp.float32)       # (H, T, D)
    attn = jnp.sum(attn, axis=0) + bo_ref[0]                    # (T, D)
    x1 = x + attn

    # ---------------- MLP sub-layer ----------------
    h2 = _layernorm(x1, ln2g_ref[0], ln2b_ref[0])
    ff = _gelu(_mm(h2, wfc_ref[0]) + bfc_ref[0])                # (T, 4D) f32
    ff = _mm(ff, wout_ref[0]) + bout_ref[0]                     # (T, D) f32

    res_ref[...] = x1 + ff

    # ---------------- final LayerNorm + head (last layer only) ----------------
    @pl.when(l == n_layers - 1)
    def _():
        hf = _layernorm(res_ref[...], lnfg_ref[...], lnfb_ref[...])   # (T, D) f32
        logits_ref[0] = _mm(hf, whead_ref[...])                       # (T, C_padded)


# ----------------------------- wrappers ---------------------------------------

_BLOCK_WEIGHT_NAMES = ('ln1_g', 'ln1_b',
                       'w_q', 'w_k', 'w_v', 'b_q', 'b_k', 'b_v',
                       'w_o', 'b_o',
                       'ln2_g', 'ln2_b',
                       'w_fc', 'b_fc', 'w_out', 'b_out')


def _layer_weight_spec(arr):
    """Per-layer weight slab: leading axis indexed by the layer grid axis."""
    nd = arr.ndim
    return pl.BlockSpec((1,) + arr.shape[1:],
                        lambda b, l, _nd=nd: (l,) + (0,) * (_nd - 1))


def run_gpt2_stack(x, blocks, ln_f_g, ln_f_b, w_head, n_heads):
    """Full transformer stack + final LN + head in a single pallas_call."""
    B, T, D = x.shape
    L = blocks['w_fc'].shape[0]
    C = w_head.shape[1]
    # Lane-dense output: pad the class dim up to a multiple of 128 with zero columns.
    Cp = max(128, ((C + 127) // 128) * 128)
    w_pad = jnp.zeros((D, Cp), jnp.bfloat16).at[:, :C].set(w_head.astype(jnp.bfloat16))

    weights = [blocks[n] for n in _BLOCK_WEIGHT_NAMES]

    in_specs = [pl.BlockSpec((1, T, D), lambda b, l: (b, 0, 0))]
    in_specs += [_layer_weight_spec(w) for w in weights]
    in_specs += [pl.BlockSpec((1, D), lambda b, l: (0, 0)),      # ln_f gamma
                 pl.BlockSpec((1, D), lambda b, l: (0, 0)),      # ln_f beta
                 pl.BlockSpec((D, Cp), lambda b, l: (0, 0))]     # head weight (padded)

    out = pl.pallas_call(
        partial(gpt2_stack_kernel, n_heads=n_heads),
        out_shape=jax.ShapeDtypeStruct((B, T, Cp), jnp.float32),
        grid=(B, L),
        in_specs=in_specs,
        out_specs=pl.BlockSpec((1, T, Cp), lambda b, l: (b, 0, 0)),
        scratch_shapes=[pltpu.VMEM((T, D), jnp.float32)],        # resident residual stream
        compiler_params=pltpu.CompilerParams(
            dimension_semantics=("parallel", "arbitrary")),
    )(x, *weights, ln_f_g, ln_f_b, w_pad)
    return out[..., :C]


def gpt2_forward(params, tokens, cfg):
    B, T = tokens.shape
    # Embeddings: token + positional (gather is glue, stays in plain JAX).
    x = params['wte'][tokens] + params['wpe'][:T][None, :, :]
    # TODO(synk): nn.Dropout is identity at inference; no stochastic dropout applied.
    logits = run_gpt2_stack(x, params['blocks'],
                            params['ln_f_g'], params['ln_f_b'], params['w_head'],
                            cfg['n_heads'])
    return logits


# ----------------------------- parameter init ---------------------------------

def init_params(key, cfg):
    D = cfg['embed_dim']
    V = cfg['vocab_size']
    P = cfg['max_seq_len']
    C = cfg['num_classes']
    L = cfg['n_layers']
    H = cfg['n_heads']
    hd = D // H
    F = 4 * D
    std = 0.02
    bf = jnp.bfloat16

    keys = iter(jax.random.split(key, 16))

    def nrm(shape, dtype=jnp.float32):
        return (std * jax.random.normal(next(keys), shape, dtype=jnp.float32)).astype(dtype)

    params = {
        'wte': nrm((V, D)),
        'wpe': nrm((P, D)),
        'ln_f_g': jnp.ones((1, D), jnp.float32),
        'ln_f_b': jnp.zeros((1, D), jnp.float32),
        'w_head': nrm((D, C)),
        # Per-layer weights stacked along a leading layer axis; MXU weights in bf16,
        # attention projections stored head-major for head-batched einsums.
        'blocks': {
            'ln1_g': jnp.ones((L, 1, D), jnp.float32),
            'ln1_b': jnp.zeros((L, 1, D), jnp.float32),
            'w_q': nrm((L, H, D, hd), bf),
            'w_k': nrm((L, H, D, hd), bf),
            'w_v': nrm((L, H, D, hd), bf),
            'b_q': jnp.zeros((L, H, 1, hd), jnp.float32),
            'b_k': jnp.zeros((L, H, 1, hd), jnp.float32),
            'b_v': jnp.zeros((L, H, 1, hd), jnp.float32),
            'w_o': nrm((L, H, hd, D), bf),
            'b_o': jnp.zeros((L, 1, D), jnp.float32),
            'ln2_g': jnp.ones((L, 1, D), jnp.float32),
            'ln2_b': jnp.zeros((L, 1, D), jnp.float32),
            'w_fc': nrm((L, D, F), bf),
            'b_fc': jnp.zeros((L, 1, F), jnp.float32),
            'w_out': nrm((L, F, D), bf),
            'b_out': jnp.zeros((L, 1, D), jnp.float32),
        },
    }
    return params


# ----------------------------- main --------------------------------------------

if __name__ == "__main__":
    cfg = dict(
        vocab_size=64,
        embed_dim=32,
        n_heads=4,
        n_layers=2,
        max_seq_len=16,
        num_classes=16,
        dropout=0.1,
    )
    key = jax.random.PRNGKey(0)
    pkey, dkey = jax.random.split(key)
    params = init_params(pkey, cfg)

    B, T = 2, 8
    tokens = jax.random.randint(dkey, (B, T), 0, cfg['vocab_size'], dtype=jnp.int32)

    logits = gpt2_forward(params, tokens, cfg)
    logits = jax.block_until_ready(logits)
    assert logits.shape == (B, T, cfg['num_classes'])
    assert bool(jnp.all(jnp.isfinite(logits)))
    print("KERNEL_OK")
</pallas_src>

<mosaic_0001>
module attributes {stable_mosaic.version = 11 : i64} {
  func.func @gpt2_stack_kernel(%arg0: i32, %arg1: i32, %arg2: memref<1x8x32xf32, #tpu.memory_space<vmem>>, %arg3: memref<1x1x32xf32, #tpu.memory_space<vmem>>, %arg4: memref<1x1x32xf32, #tpu.memory_space<vmem>>, %arg5: memref<1x4x32x8xbf16, #tpu.memory_space<vmem>>, %arg6: memref<1x4x32x8xbf16, #tpu.memory_space<vmem>>, %arg7: memref<1x4x32x8xbf16, #tpu.memory_space<vmem>>, %arg8: memref<1x4x1x8xf32, #tpu.memory_space<vmem>>, %arg9: memref<1x4x1x8xf32, #tpu.memory_space<vmem>>, %arg10: memref<1x4x1x8xf32, #tpu.memory_space<vmem>>, %arg11: memref<1x4x8x32xbf16, #tpu.memory_space<vmem>>, %arg12: memref<1x1x32xf32, #tpu.memory_space<vmem>>, %arg13: memref<1x1x32xf32, #tpu.memory_space<vmem>>, %arg14: memref<1x1x32xf32, #tpu.memory_space<vmem>>, %arg15: memref<1x32x128xbf16, #tpu.memory_space<vmem>>, %arg16: memref<1x1x128xf32, #tpu.memory_space<vmem>>, %arg17: memref<1x128x32xbf16, #tpu.memory_space<vmem>>, %arg18: memref<1x1x32xf32, #tpu.memory_space<vmem>>, %arg19: memref<1x32xf32, #tpu.memory_space<vmem>>, %arg20: memref<1x32xf32, #tpu.memory_space<vmem>>, %arg21: memref<32x128xbf16, #tpu.memory_space<vmem>>, %arg22: memref<1x8x128xf32, #tpu.memory_space<vmem>>, %arg23: memref<8x32xf32, #tpu.memory_space<vmem>>) attributes {dimension_semantics = [#tpu.dimension_semantics<parallel>, #tpu.dimension_semantics<arbitrary>], iteration_bounds = array<i64: 2, 2>, scalar_prefetch = 0 : i64, scratch_operands = 1 : i64, tpu.core_type = #tpu.core_type<tc>, window_params = [{transform_indices = @transform_0, window_bounds = array<i64: 1, 8, 32>}, {transform_indices = @transform_1, window_bounds = array<i64: 1, 1, 32>}, {transform_indices = @transform_2, window_bounds = array<i64: 1, 1, 32>}, {transform_indices = @transform_3, window_bounds = array<i64: 1, 4, 32, 8>}, {transform_indices = @transform_4, window_bounds = array<i64: 1, 4, 32, 8>}, {transform_indices = @transform_5, window_bounds = array<i64: 1, 4, 32, 8>}, {transform_indices = @transform_6, window_bounds = array<i64: 1, 4, 1, 8>}, {transform_indices = @transform_7, window_bounds = array<i64: 1, 4, 1, 8>}, {transform_indices = @transform_8, window_bounds = array<i64: 1, 4, 1, 8>}, {transform_indices = @transform_9, window_bounds = array<i64: 1, 4, 8, 32>}, {transform_indices = @transform_10, window_bounds = array<i64: 1, 1, 32>}, {transform_indices = @transform_11, window_bounds = array<i64: 1, 1, 32>}, {transform_indices = @transform_12, window_bounds = array<i64: 1, 1, 32>}, {transform_indices = @transform_13, window_bounds = array<i64: 1, 32, 128>}, {transform_indices = @transform_14, window_bounds = array<i64: 1, 1, 128>}, {transform_indices = @transform_15, window_bounds = array<i64: 1, 128, 32>}, {transform_indices = @transform_16, window_bounds = array<i64: 1, 1, 32>}, {pipeline_mode = #tpu.pipeline_mode<synchronous>, transform_indices = @transform_17, window_bounds = array<i64: 1, 32>}, {pipeline_mode = #tpu.pipeline_mode<synchronous>, transform_indices = @transform_18, window_bounds = array<i64: 1, 32>}, {pipeline_mode = #tpu.pipeline_mode<synchronous>, transform_indices = @transform_19, window_bounds = array<i64: 32, 128>}, {transform_indices = @transform_20, window_bounds = array<i64: 1, 8, 128>}]} {
    %c0_i32 = arith.constant 0 : i32
    %0 = arith.cmpi eq, %arg1, %c0_i32 : i32
    %1 = arith.extui %0 : i1 to i32
    %c0_i32_0 = arith.constant 0 : i32
    %2 = arith.cmpi ne, %1, %c0_i32_0 : i32
    scf.if %2 {
      %c0_87 = arith.constant 0 : index
      %c0_88 = arith.constant 0 : index
      %c0_89 = arith.constant 0 : index
      %152 = vector.load %arg2[%c0_87, %c0_88, %c0_89] : memref<1x8x32xf32, #tpu.memory_space<vmem>>, vector<1x8x32xf32>
      %153 = vector.shape_cast %152 : vector<1x8x32xf32> to vector<8x32xf32>
      %c0_90 = arith.constant 0 : index
      %c0_91 = arith.constant 0 : index
      %154 = vector.load %arg23[%c0_90, %c0_91] : memref<8x32xf32, #tpu.memory_space<vmem>>, vector<8x32xf32>
      tpu.vector_store %arg23[%c0_90, %c0_91], %153 {strides = array<i32>} : memref<8x32xf32, #tpu.memory_space<vmem>>, vector<8x32xf32>,
    } else {
    }
    %c0 = arith.constant 0 : index
    %c0_1 = arith.constant 0 : index
    %3 = vector.load %arg23[%c0, %c0_1] : memref<8x32xf32, #tpu.memory_space<vmem>>, vector<8x32xf32>
    %c0_2 = arith.constant 0 : index
    %c0_3 = arith.constant 0 : index
    %c0_4 = arith.constant 0 : index
    %4 = vector.load %arg3[%c0_2, %c0_3, %c0_4] : memref<1x1x32xf32, #tpu.memory_space<vmem>>, vector<1x1x32xf32>
    %5 = vector.shape_cast %4 : vector<1x1x32xf32> to vector<1x32xf32>
    %c0_5 = arith.constant 0 : index
    %c0_6 = arith.constant 0 : index
    %c0_7 = arith.constant 0 : index
    %6 = vector.load %arg4[%c0_5, %c0_6, %c0_7] : memref<1x1x32xf32, #tpu.memory_space<vmem>>, vector<1x1x32xf32>
    %7 = vector.shape_cast %6 : vector<1x1x32xf32> to vector<1x32xf32>
    %cst = arith.constant dense<0.000000e+00> : vector<8xf32>
    %8 = vector.multi_reduction <add>, %3, %cst [1] : vector<8x32xf32> to vector<8xf32>
    %9 = vector.shape_cast %8 : vector<8xf32> to vector<8x1xf32>
    %cst_8 = arith.constant 3.200000e+01 : f32
    %10 = vector.broadcast %cst_8 : f32 to vector<8x1xf32>
    %11 = arith.divf %9, %10 : vector<8x1xf32>
    %12 = vector.broadcast %11 : vector<8x1xf32> to vector<8x32xf32>
    %13 = arith.subf %3, %12 : vector<8x32xf32>
    %14 = arith.mulf %13, %13 : vector<8x32xf32>
    %cst_9 = arith.constant dense<0.000000e+00> : vector<8xf32>
    %15 = vector.multi_reduction <add>, %14, %cst_9 [1] : vector<8x32xf32> to vector<8xf32>
    %16 = vector.shape_cast %15 : vector<8xf32> to vector<8x1xf32>
    %cst_10 = arith.constant 3.200000e+01 : f32
    %17 = vector.broadcast %cst_10 : f32 to vector<8x1xf32>
    %18 = arith.divf %16, %17 : vector<8x1xf32>
    %19 = vector.broadcast %11 : vector<8x1xf32> to vector<8x32xf32>
    %20 = arith.subf %3, %19 : vector<8x32xf32>
    %cst_11 = arith.constant 9.99999974E-6 : f32
    %21 = vector.broadcast %cst_11 : f32 to vector<8x1xf32>
    %22 = arith.addf %18, %21 : vector<8x1xf32>
    %23 = math.rsqrt %22 : vector<8x1xf32>
    %24 = vector.broadcast %23 : vector<8x1xf32> to vector<8x32xf32>
    %25 = arith.mulf %20, %24 : vector<8x32xf32>
    %26 = vector.broadcast %5 : vector<1x32xf32> to vector<8x32xf32>
    %27 = arith.mulf %25, %26 : vector<8x32xf32>
    %28 = vector.broadcast %7 : vector<1x32xf32> to vector<8x32xf32>
    %29 = arith.addf %27, %28 : vector<8x32xf32>
    %30 = arith.truncf %29 : vector<8x32xf32> to vector<8x32xbf16>
    %31 = vector.shape_cast %30 : vector<8x32xbf16> to vector<1x8x32xbf16>
    %32 = vector.shape_cast %31 : vector<1x8x32xbf16> to vector<1x8x32xbf16>
    %33 = vector.broadcast %32 : vector<1x8x32xbf16> to vector<4x8x32xbf16>
    %c0_12 = arith.constant 0 : index
    %c0_13 = arith.constant 0 : index
    %c0_14 = arith.constant 0 : index
    %c0_15 = arith.constant 0 : index
    %34 = vector.load %arg5[%c0_12, %c0_13, %c0_14, %c0_15] : memref<1x4x32x8xbf16, #tpu.memory_space<vmem>>, vector<1x4x32x8xbf16>
    %35 = vector.shape_cast %34 : vector<1x4x32x8xbf16> to vector<4x32x8xbf16>
    "tpu.trace_start"() <{level = 10 : i32, message = "htd,hdk->htk"}> : () -> ()
    %cst_16 = arith.constant dense<0.000000e+00> : vector<4x8x8xf32>
    %36 = tpu.matmul %33, %35, %cst_16 {dimension_numbers = #tpu.dot_dimension_numbers<[2], [1], [1], [2], [0, 0, 0, 1, 1, 2], [0], [0]>} : vector<4x8x32xbf16>, vector<4x32x8xbf16>, vector<4x8x8xf32> -> vector<4x8x8xf32>
    "tpu.trace_stop"() : () -> ()
    %c0_17 = arith.constant 0 : index
    %c0_18 = arith.constant 0 : index
    %c0_19 = arith.constant 0 : index
    %c0_20 = arith.constant 0 : index
    %37 = vector.load %arg8[%c0_17, %c0_18, %c0_19, %c0_20] : memref<1x4x1x8xf32, #tpu.memory_space<vmem>>, vector<1x4x1x8xf32>
    %38 = vector.shape_cast %37 : vector<1x4x1x8xf32> to vector<4x1x8xf32>
    %39 = vector.broadcast %38 : vector<4x1x8xf32> to vector<4x8x8xf32>
    %40 = arith.addf %36, %39 : vector<4x8x8xf32>
    %c0_21 = arith.constant 0 : index
    %c0_22 = arith.constant 0 : index
    %c0_23 = arith.constant 0 : index
    %c0_24 = arith.constant 0 : index
    %41 = vector.load %arg6[%c0_21, %c0_22, %c0_23, %c0_24] : memref<1x4x32x8xbf16, #tpu.memory_space<vmem>>, vector<1x4x32x8xbf16>
    %42 = vector.shape_cast %41 : vector<1x4x32x8xbf16> to vector<4x32x8xbf16>
    "tpu.trace_start"() <{level = 10 : i32, message = "htd,hdk->htk"}> : () -> ()
    %cst_25 = arith.constant dense<0.000000e+00> : vector<4x8x8xf32>
    %43 = tpu.matmul %33, %42, %cst_25 {dimension_numbers = #tpu.dot_dimension_numbers<[2], [1], [1], [2], [0, 0, 0, 1, 1, 2], [0], [0]>} : vector<4x8x32xbf16>, vector<4x32x8xbf16>, vector<4x8x8xf32> -> vector<4x8x8xf32>
    "tpu.trace_stop"() : () -> ()
    %c0_26 = arith.constant 0 : index
    %c0_27 = arith.constant 0 : index
    %c0_28 = arith.constant 0 : index
    %c0_29 = arith.constant 0 : index
    %44 = vector.load %arg9[%c0_26, %c0_27, %c0_28, %c0_29] : memref<1x4x1x8xf32, #tpu.memory_space<vmem>>, vector<1x4x1x8xf32>
    %45 = vector.shape_cast %44 : vector<1x4x1x8xf32> to vector<4x1x8xf32>
    %46 = vector.broadcast %45 : vector<4x1x8xf32> to vector<4x8x8xf32>
    %47 = arith.addf %43, %46 : vector<4x8x8xf32>
    %c0_30 = arith.constant 0 : index
    %c0_31 = arith.constant 0 : index
    %c0_32 = arith.constant 0 : index
    %c0_33 = arith.constant 0 : index
    %48 = vector.load %arg7[%c0_30, %c0_31, %c0_32, %c0_33] : memref<1x4x32x8xbf16, #tpu.memory_space<vmem>>, vector<1x4x32x8xbf16>
    %49 = vector.shape_cast %48 : vector<1x4x32x8xbf16> to vector<4x32x8xbf16>
    "tpu.trace_start"() <{level = 10 : i32, message = "htd,hdk->htk"}> : () -> ()
    %cst_34 = arith.constant dense<0.000000e+00> : vector<4x8x8xf32>
    %50 = tpu.matmul %33, %49, %cst_34 {dimension_numbers = #tpu.dot_dimension_numbers<[2], [1], [1], [2], [0, 0, 0, 1, 1, 2], [0], [0]>} : vector<4x8x32xbf16>, vector<4x32x8xbf16>, vector<4x8x8xf32> -> vector<4x8x8xf32>
    "tpu.trace_stop"() : () -> ()
    %c0_35 = arith.constant 0 : index
    %c0_36 = arith.constant 0 : index
    %c0_37 = arith.constant 0 : index
    %c0_38 = arith.constant 0 : index
    %51 = vector.load %arg10[%c0_35, %c0_36, %c0_37, %c0_38] : memref<1x4x1x8xf32, #tpu.memory_space<vmem>>, vector<1x4x1x8xf32>
    %52 = vector.shape_cast %51 : vector<1x4x1x8xf32> to vector<4x1x8xf32>
    %53 = vector.broadcast %52 : vector<4x1x8xf32> to vector<4x8x8xf32>
    %54 = arith.addf %50, %53 : vector<4x8x8xf32>
    %cst_39 = arith.constant 0.353553385 : f32
    %55 = vector.broadcast %cst_39 : f32 to vector<4x8x8xf32>
    %56 = arith.mulf %40, %55 : vector<4x8x8xf32>
    %57 = tpu.iota {dimensions = array<i32: 0>} : vector<8x8xi32>
    %58 = tpu.iota {dimensions = array<i32: 1>} : vector<8x8xi32>
    %59 = arith.cmpi sle, %58, %57 : vector<8x8xi32>
    %cst_40 = arith.constant 0.000000e+00 : f32
    %cst_41 = arith.constant -1.000000e+30 : f32
    %60 = vector.broadcast %cst_40 : f32 to vector<8x8xf32>
    %61 = vector.broadcast %cst_41 : f32 to vector<8x8xf32>
    %62 = arith.select %59, %60, %61 : vector<8x8xi1>, vector<8x8xf32>
    %63 = arith.truncf %56 : vector<4x8x8xf32> to vector<4x8x8xbf16>
    %64 = arith.truncf %47 : vector<4x8x8xf32> to vector<4x8x8xbf16>
    "tpu.trace_start"() <{level = 10 : i32, message = "hqd,hkd->hqk"}> : () -> ()
    %cst_42 = arith.constant dense<0.000000e+00> : vector<4x8x8xf32>
    %65 = tpu.matmul %63, %64, %cst_42 {dimension_numbers = #tpu.dot_dimension_numbers<[2], [2], [1], [1], [0, 0, 0, 1, 1, 1], [0], [0]>} : vector<4x8x8xbf16>, vector<4x8x8xbf16>, vector<4x8x8xf32> -> vector<4x8x8xf32>
    "tpu.trace_stop"() : () -> ()
    %66 = vector.shape_cast %62 : vector<8x8xf32> to vector<1x8x8xf32>
    %67 = vector.broadcast %66 : vector<1x8x8xf32> to vector<4x8x8xf32>
    %68 = arith.addf %65, %67 : vector<4x8x8xf32>
    %cst_43 = arith.constant dense<0xFF800000> : vector<4x8xf32>
    %69 = vector.multi_reduction <maximumf>, %68, %cst_43 [2] : vector<4x8x8xf32> to vector<4x8xf32>
    %70 = vector.shape_cast %69 : vector<4x8xf32> to vector<4x8x1xf32>
    %71 = vector.broadcast %70 : vector<4x8x1xf32> to vector<4x8x8xf32>
    %72 = arith.subf %68, %71 : vector<4x8x8xf32>
    %73 = math.exp %72 : vector<4x8x8xf32>
    %cst_44 = arith.constant dense<0.000000e+00> : vector<4x8xf32>
    %74 = vector.multi_reduction <add>, %73, %cst_44 [2] : vector<4x8x8xf32> to vector<4x8xf32>
    %75 = vector.shape_cast %74 : vector<4x8xf32> to vector<4x8x1xf32>
    %76 = tpu.reciprocal %75 {approx = true} : vector<4x8x1xf32> -> vector<4x8x1xf32>
    %77 = vector.broadcast %76 : vector<4x8x1xf32> to vector<4x8x8xf32>
    %78 = arith.mulf %73, %77 : vector<4x8x8xf32>
    %79 = arith.truncf %78 : vector<4x8x8xf32> to vector<4x8x8xbf16>
    %80 = arith.truncf %54 : vector<4x8x8xf32> to vector<4x8x8xbf16>
    "tpu.trace_start"() <{level = 10 : i32, message = "hqk,hkd->hqd"}> : () -> ()
    %cst_45 = arith.constant dense<0.000000e+00> : vector<4x8x8xf32>
    %81 = tpu.matmul %79, %80, %cst_45 {dimension_numbers = #tpu.dot_dimension_numbers<[2], [1], [1], [2], [0, 0, 0, 1, 1, 2], [0], [0]>} : vector<4x8x8xbf16>, vector<4x8x8xbf16>, vector<4x8x8xf32> -> vector<4x8x8xf32>
    "tpu.trace_stop"() : () -> ()
    %82 = arith.truncf %81 : vector<4x8x8xf32> to vector<4x8x8xbf16>
    %c0_46 = arith.constant 0 : index
    %c0_47 = arith.constant 0 : index
    %c0_48 = arith.constant 0 : index
    %c0_49 = arith.constant 0 : index
    %83 = vector.load %arg11[%c0_46, %c0_47, %c0_48, %c0_49] : memref<1x4x8x32xbf16, #tpu.memory_space<vmem>>, vector<1x4x8x32xbf16>
    %84 = vector.shape_cast %83 : vector<1x4x8x32xbf16> to vector<4x8x32xbf16>
    "tpu.trace_start"() <{level = 10 : i32, message = "htd,hdk->htk"}> : () -> ()
    %cst_50 = arith.constant dense<0.000000e+00> : vector<4x8x32xf32>
    %85 = tpu.matmul %82, %84, %cst_50 {dimension_numbers = #tpu.dot_dimension_numbers<[2], [1], [1], [2], [0, 0, 0, 1, 1, 2], [0], [0]>} : vector<4x8x8xbf16>, vector<4x8x32xbf16>, vector<4x8x32xf32> -> vector<4x8x32xf32>
    "tpu.trace_stop"() : () -> ()
    %cst_51 = arith.constant dense<0.000000e+00> : vector<8x32xf32>
    %86 = vector.multi_reduction <add>, %85, %cst_51 [0] : vector<4x8x32xf32> to vector<8x32xf32>
    %c0_52 = arith.constant 0 : index
    %c0_53 = arith.constant 0 : index
    %c0_54 = arith.constant 0 : index
    %87 = vector.load %arg12[%c0_52, %c0_53, %c0_54] : memref<1x1x32xf32, #tpu.memory_space<vmem>>, vector<1x1x32xf32>
    %88 = vector.shape_cast %87 : vector<1x1x32xf32> to vector<1x32xf32>
    %89 = vector.broadcast %88 : vector<1x32xf32> to vector<8x32xf32>
    %90 = arith.addf %86, %89 : vector<8x32xf32>
    %91 = arith.addf %3, %90 : vector<8x32xf32>
    %c0_55 = arith.constant 0 : index
    %c0_56 = arith.constant 0 : index
    %c0_57 = arith.constant 0 : index
    %92 = vector.load %arg13[%c0_55, %c0_56, %c0_57] : memref<1x1x32xf32, #tpu.memory_space<vmem>>, vector<1x1x32xf32>
    %93 = vector.shape_cast %92 : vector<1x1x32xf32> to vector<1x32xf32>
    %c0_58 = arith.constant 0 : index
    %c0_59 = arith.constant 0 : index
    %c0_60 = arith.constant 0 : index
    %94 = vector.load %arg14[%c0_58, %c0_59, %c0_60] : memref<1x1x32xf32, #tpu.memory_space<vmem>>, vector<1x1x32xf32>
    %95 = vector.shape_cast %94 : vector<1x1x32xf32> to vector<1x32xf32>
    %cst_61 = arith.constant dense<0.000000e+00> : vector<8xf32>
    %96 = vector.multi_reduction <add>, %91, %cst_61 [1] : vector<8x32xf32> to vector<8xf32>
    %97 = vector.shape_cast %96 : vector<8xf32> to vector<8x1xf32>
    %cst_62 = arith.constant 3.200000e+01 : f32
    %98 = vector.broadcast %cst_62 : f32 to vector<8x1xf32>
    %99 = arith.divf %97, %98 : vector<8x1xf32>
    %100 = vector.broadcast %99 : vector<8x1xf32> to vector<8x32xf32>
    %101 = arith.subf %91, %100 : vector<8x32xf32>
    %102 = arith.mulf %101, %101 : vector<8x32xf32>
    %cst_63 = arith.constant dense<0.000000e+00> : vector<8xf32>
    %103 = vector.multi_reduction <add>, %102, %cst_63 [1] : vector<8x32xf32> to vector<8xf32>
    %104 = vector.shape_cast %103 : vector<8xf32> to vector<8x1xf32>
    %cst_64 = arith.constant 3.200000e+01 : f32
    %105 = vector.broadcast %cst_64 : f32 to vector<8x1xf32>
    %106 = arith.divf %104, %105 : vector<8x1xf32>
    %107 = vector.broadcast %99 : vector<8x1xf32> to vector<8x32xf32>
    %108 = arith.subf %91, %107 : vector<8x32xf32>
    %cst_65 = arith.constant 9.99999974E-6 : f32
    %109 = vector.broadcast %cst_65 : f32 to vector<8x1xf32>
    %110 = arith.addf %106, %109 : vector<8x1xf32>
    %111 = math.rsqrt %110 : vector<8x1xf32>
    %112 = vector.broadcast %111 : vector<8x1xf32> to vector<8x32xf32>
    %113 = arith.mulf %108, %112 : vector<8x32xf32>
    %114 = vector.broadcast %93 : vector<1x32xf32> to vector<8x32xf32>
    %115 = arith.mulf %113, %114 : vector<8x32xf32>
    %116 = vector.broadcast %95 : vector<1x32xf32> to vector<8x32xf32>
    %117 = arith.addf %115, %116 : vector<8x32xf32>
    %c0_66 = arith.constant 0 : index
    %c0_67 = arith.constant 0 : index
    %c0_68 = arith.constant 0 : index
    %118 = vector.load %arg15[%c0_66, %c0_67, %c0_68] : memref<1x32x128xbf16, #tpu.memory_space<vmem>>, vector<1x32x128xbf16>
    %119 = vector.shape_cast %118 : vector<1x32x128xbf16> to vector<32x128xbf16>
    %120 = arith.truncf %117 : vector<8x32xf32> to vector<8x32xbf16>
    %cst_69 = arith.constant dense<0.000000e+00> : vector<8x128xf32>
    %121 = tpu.matmul %120, %119, %cst_69 {dimension_numbers = #tpu.dot_dimension_numbers<[1], [0], [0], [1], [0, 0, 1, 1], [], []>} : vector<8x32xbf16>, vector<32x128xbf16>, vector<8x128xf32> -> vector<8x128xf32>
    %c0_70 = arith.constant 0 : index
    %c0_71 = arith.constant 0 : index
    %c0_72 = arith.constant 0 : index
    %122 = vector.load %arg16[%c0_70, %c0_71, %c0_72] : memref<1x1x128xf32, #tpu.memory_space<vmem>>, vector<1x1x128xf32>
    %123 = vector.shape_cast %122 : vector<1x1x128xf32> to vector<1x128xf32>
    %124 = vector.broadcast %123 : vector<1x128xf32> to vector<8x128xf32>
    %125 = arith.addf %121, %124 : vector<8x128xf32>
    %cst_73 = arith.constant 5.000000e-01 : f32
    %126 = vector.broadcast %cst_73 : f32 to vector<8x128xf32>
    %127 = arith.mulf %126, %125 : vector<8x128xf32>
    %cst_74 = arith.constant 4.471500e-02 : f32
    %128 = vector.broadcast %cst_74 : f32 to vector<8x128xf32>
    %129 = arith.mulf %128, %125 : vector<8x128xf32>
    %130 = arith.mulf %129, %125 : vector<8x128xf32>
    %131 = arith.mulf %130, %125 : vector<8x128xf32>
    %132 = arith.addf %125, %131 : vector<8x128xf32>
    %cst_75 = arith.constant 0.797884583 : f32
    %133 = vector.broadcast %cst_75 : f32 to vector<8x128xf32>
    %134 = arith.mulf %133, %132 : vector<8x128xf32>
    %135 = math.tanh %134 : vector<8x128xf32>
    %cst_76 = arith.constant 1.000000e+00 : f32
    %136 = vector.broadcast %cst_76 : f32 to vector<8x128xf32>
    %137 = arith.addf %136, %135 : vector<8x128xf32>
    %138 = arith.mulf %127, %137 : vector<8x128xf32>
    %c0_77 = arith.constant 0 : index
    %c0_78 = arith.constant 0 : index
    %c0_79 = arith.constant 0 : index
    %139 = vector.load %arg17[%c0_77, %c0_78, %c0_79] : memref<1x128x32xbf16, #tpu.memory_space<vmem>>, vector<1x128x32xbf16>
    %140 = vector.shape_cast %139 : vector<1x128x32xbf16> to vector<128x32xbf16>
    %141 = arith.truncf %138 : vector<8x128xf32> to vector<8x128xbf16>
    %cst_80 = arith.constant dense<0.000000e+00> : vector<8x32xf32>
    %142 = tpu.matmul %141, %140, %cst_80 {dimension_numbers = #tpu.dot_dimension_numbers<[1], [0], [0], [1], [0, 0, 1, 1], [], []>} : vector<8x128xbf16>, vector<128x32xbf16>, vector<8x32xf32> -> vector<8x32xf32>
    %c0_81 = arith.constant 0 : index
    %c0_82 = arith.constant 0 : index
    %c0_83 = arith.constant 0 : index
    %143 = vector.load %arg18[%c0_81, %c0_82, %c0_83] : memref<1x1x32xf32, #tpu.memory_space<vmem>>, vector<1x1x32xf32>
    %144 = vector.shape_cast %143 : vector<1x1x32xf32> to vector<1x32xf32>
    %145 = vector.broadcast %144 : vector<1x32xf32> to vector<8x32xf32>
    %146 = arith.addf %142, %145 : vector<8x32xf32>
    %147 = arith.addf %91, %146 : vector<8x32xf32>
    %c0_84 = arith.constant 0 : index
    %c0_85 = arith.constant 0 : index
    %148 = vector.load %arg23[%c0_84, %c0_85] : memref<8x32xf32, #tpu.memory_space<vmem>>, vector<8x32xf32>
    tpu.vector_store %arg23[%c0_84, %c0_85], %147 {strides = array<i32>} : memref<8x32xf32, #tpu.memory_space<vmem>>, vector<8x32xf32>,
    %c1_i32 = arith.constant 1 : i32
    %149 = arith.cmpi eq, %arg1, %c1_i32 : i32
    %150 = arith.extui %149 : i1 to i32
    %c0_i32_86 = arith.constant 0 : i32
    %151 = arith.cmpi ne, %150, %c0_i32_86 : i32
    scf.if %151 {
      %c0_87 = arith.constant 0 : index
      %c0_88 = arith.constant 0 : index
      %152 = vector.load %arg23[%c0_87, %c0_88] : memref<8x32xf32, #tpu.memory_space<vmem>>, vector<8x32xf32>
      %c0_89 = arith.constant 0 : index
      %c0_90 = arith.constant 0 : index
      %153 = vector.load %arg19[%c0_89, %c0_90] : memref<1x32xf32, #tpu.memory_space<vmem>>, vector<1x32xf32>
      %c0_91 = arith.constant 0 : index
      %c0_92 = arith.constant 0 : index
      %154 = vector.load %arg20[%c0_91, %c0_92] : memref<1x32xf32, #tpu.memory_space<vmem>>, vector<1x32xf32>
      %cst_93 = arith.constant dense<0.000000e+00> : vector<8xf32>
      %155 = vector.multi_reduction <add>, %152, %cst_93 [1] : vector<8x32xf32> to vector<8xf32>
      %156 = vector.shape_cast %155 : vector<8xf32> to vector<8x1xf32>
      %cst_94 = arith.constant 3.200000e+01 : f32
      %157 = vector.broadcast %cst_94 : f32 to vector<8x1xf32>
      %158 = arith.divf %156, %157 : vector<8x1xf32>
      %159 = vector.broadcast %158 : vector<8x1xf32> to vector<8x32xf32>
      %160 = arith.subf %152, %159 : vector<8x32xf32>
      %161 = arith.mulf %160, %160 : vector<8x32xf32>
      %cst_95 = arith.constant dense<0.000000e+00> : vector<8xf32>
      %162 = vector.multi_reduction <add>, %161, %cst_95 [1] : vector<8x32xf32> to vector<8xf32>
      %163 = vector.shape_cast %162 : vector<8xf32> to vector<8x1xf32>
      %cst_96 = arith.constant 3.200000e+01 : f32
      %164 = vector.broadcast %cst_96 : f32 to vector<8x1xf32>
      %165 = arith.divf %163, %164 : vector<8x1xf32>
      %166 = vector.broadcast %158 : vector<8x1xf32> to vector<8x32xf32>
      %167 = arith.subf %152, %166 : vector<8x32xf32>
      %cst_97 = arith.constant 9.99999974E-6 : f32
      %168 = vector.broadcast %cst_97 : f32 to vector<8x1xf32>
      %169 = arith.addf %165, %168 : vector<8x1xf32>
      %170 = math.rsqrt %169 : vector<8x1xf32>
      %171 = vector.broadcast %170 : vector<8x1xf32> to vector<8x32xf32>
      %172 = arith.mulf %167, %171 : vector<8x32xf32>
      %173 = vector.broadcast %153 : vector<1x32xf32> to vector<8x32xf32>
      %174 = arith.mulf %172, %173 : vector<8x32xf32>
      %175 = vector.broadcast %154 : vector<1x32xf32> to vector<8x32xf32>
      %176 = arith.addf %174, %175 : vector<8x32xf32>
      %c0_98 = arith.constant 0 : index
      %c0_99 = arith.constant 0 : index
      %177 = vector.load %arg21[%c0_98, %c0_99] : memref<32x128xbf16, #tpu.memory_space<vmem>>, vector<32x128xbf16>
      %178 = arith.truncf %176 : vector<8x32xf32> to vector<8x32xbf16>
      %cst_100 = arith.constant dense<0.000000e+00> : vector<8x128xf32>
      %179 = tpu.matmul %178, %177, %cst_100 {dimension_numbers = #tpu.dot_dimension_numbers<[1], [0], [0], [1], [0, 0, 1, 1], [], []>} : vector<8x32xbf16>, vector<32x128xbf16>, vector<8x128xf32> -> vector<8x128xf32>
      %c0_101 = arith.constant 0 : index
      %c0_102 = arith.constant 0 : index
      %c0_103 = arith.constant 0 : index
      %180 = vector.load %arg22[%c0_101, %c0_102, %c0_103] : memref<1x8x128xf32, #tpu.memory_space<vmem>>, vector<1x8x128xf32>
      %181 = vector.shape_cast %180 : vector<1x8x128xf32> to vector<8x128xf32>
      %182 = vector.shape_cast %179 : vector<8x128xf32> to vector<1x8x128xf32>
      tpu.vector_store %arg22[%c0_101, %c0_102, %c0_103], %182 {strides = array<i32>} : memref<1x8x128xf32, #tpu.memory_space<vmem>>, vector<1x8x128xf32>,
    } else {
    }
    return
  }
  func.func @transform_0(%arg0: i32, %arg1: i32) -> (i32, i32, i32) {
    %c0_i32 = arith.constant 0 : i32
    %c0_i32_0 = arith.constant 0 : i32
    %c0_i32_1 = arith.constant 0 : i32
    return %arg0, %c0_i32, %c0_i32_0 : i32, i32, i32
  }
  func.func @transform_1(%arg0: i32, %arg1: i32) -> (i32, i32, i32) {
    %c0_i32 = arith.constant 0 : i32
    %c0_i32_0 = arith.constant 0 : i32
    %c0_i32_1 = arith.constant 0 : i32
    return %arg1, %c0_i32, %c0_i32_0 : i32, i32, i32
  }
  func.func @transform_2(%arg0: i32, %arg1: i32) -> (i32, i32, i32) {
    %c0_i32 = arith.constant 0 : i32
    %c0_i32_0 = arith.constant 0 : i32
    %c0_i32_1 = arith.constant 0 : i32
    return %arg1, %c0_i32, %c0_i32_0 : i32, i32, i32
  }
  func.func @transform_3(%arg0: i32, %arg1: i32) -> (i32, i32, i32, i32) {
    %c0_i32 = arith.constant 0 : i32
    %c0_i32_0 = arith.constant 0 : i32
    %c0_i32_1 = arith.constant 0 : i32
    %c0_i32_2 = arith.constant 0 : i32
    return %arg1, %c0_i32, %c0_i32_0, %c0_i32_1 : i32, i32, i32, i32
  }
  func.func @transform_4(%arg0: i32, %arg1: i32) -> (i32, i32, i32, i32) {
    %c0_i32 = arith.constant 0 : i32
    %c0_i32_0 = arith.constant 0 : i32
    %c0_i32_1 = arith.constant 0 : i32
    %c0_i32_2 = arith.constant 0 : i32
    return %arg1, %c0_i32, %c0_i32_0, %c0_i32_1 : i32, i32, i32, i32
  }
  func.func @transform_5(%arg0: i32, %arg1: i32) -> (i32, i32, i32, i32) {
    %c0_i32 = arith.constant 0 : i32
    %c0_i32_0 = arith.constant 0 : i32
    %c0_i32_1 = arith.constant 0 : i32
    %c0_i32_2 = arith.constant 0 : i32
    return %arg1, %c0_i32, %c0_i32_0, %c0_i32_1 : i32, i32, i32, i32
  }
  func.func @transform_6(%arg0: i32, %arg1: i32) -> (i32, i32, i32, i32) {
    %c0_i32 = arith.constant 0 : i32
    %c0_i32_0 = arith.constant 0 : i32
    %c0_i32_1 = arith.constant 0 : i32
    %c0_i32_2 = arith.constant 0 : i32
    return %arg1, %c0_i32, %c0_i32_0, %c0_i32_1 : i32, i32, i32, i32
  }
  func.func @transform_7(%arg0: i32, %arg1: i32) -> (i32, i32, i32, i32) {
    %c0_i32 = arith.constant 0 : i32
    %c0_i32_0 = arith.constant 0 : i32
    %c0_i32_1 = arith.constant 0 : i32
    %c0_i32_2 = arith.constant 0 : i32
    return %arg1, %c0_i32, %c0_i32_0, %c0_i32_1 : i32, i32, i32, i32
  }
  func.func @transform_8(%arg0: i32, %arg1: i32) -> (i32, i32, i32, i32) {
    %c0_i32 = arith.constant 0 : i32
    %c0_i32_0 = arith.constant 0 : i32
    %c0_i32_1 = arith.constant 0 : i32
    %c0_i32_2 = arith.constant 0 : i32
    return %arg1, %c0_i32, %c0_i32_0, %c0_i32_1 : i32, i32, i32, i32
  }
  func.func @transform_9(%arg0: i32, %arg1: i32) -> (i32, i32, i32, i32) {
    %c0_i32 = arith.constant 0 : i32
    %c0_i32_0 = arith.constant 0 : i32
    %c0_i32_1 = arith.constant 0 : i32
    %c0_i32_2 = arith.constant 0 : i32
    return %arg1, %c0_i32, %c0_i32_0, %c0_i32_1 : i32, i32, i32, i32
  }
  func.func @transform_10(%arg0: i32, %arg1: i32) -> (i32, i32, i32) {
    %c0_i32 = arith.constant 0 : i32
    %c0_i32_0 = arith.constant 0 : i32
    %c0_i32_1 = arith.constant 0 : i32
    return %arg1, %c0_i32, %c0_i32_0 : i32, i32, i32
  }
  func.func @transform_11(%arg0: i32, %arg1: i32) -> (i32, i32, i32) {
    %c0_i32 = arith.constant 0 : i32
    %c0_i32_0 = arith.constant 0 : i32
    %c0_i32_1 = arith.constant 0 : i32
    return %arg1, %c0_i32, %c0_i32_0 : i32, i32, i32
  }
  func.func @transform_12(%arg0: i32, %arg1: i32) -> (i32, i32, i32) {
    %c0_i32 = arith.constant 0 : i32
    %c0_i32_0 = arith.constant 0 : i32
    %c0_i32_1 = arith.constant 0 : i32
    return %arg1, %c0_i32, %c0_i32_0 : i32, i32, i32
  }
  func.func @transform_13(%arg0: i32, %arg1: i32) -> (i32, i32, i32) {
    %c0_i32 = arith.constant 0 : i32
    %c0_i32_0 = arith.constant 0 : i32
    %c0_i32_1 = arith.constant 0 : i32
    return %arg1, %c0_i32, %c0_i32_0 : i32, i32, i32
  }
  func.func @transform_14(%arg0: i32, %arg1: i32) -> (i32, i32, i32) {
    %c0_i32 = arith.constant 0 : i32
    %c0_i32_0 = arith.constant 0 : i32
    %c0_i32_1 = arith.constant 0 : i32
    return %arg1, %c0_i32, %c0_i32_0 : i32, i32, i32
  }
  func.func @transform_15(%arg0: i32, %arg1: i32) -> (i32, i32, i32) {
    %c0_i32 = arith.constant 0 : i32
    %c0_i32_0 = arith.constant 0 : i32
    %c0_i32_1 = arith.constant 0 : i32
    return %arg1, %c0_i32, %c0_i32_0 : i32, i32, i32
  }
  func.func @transform_16(%arg0: i32, %arg1: i32) -> (i32, i32, i32) {
    %c0_i32 = arith.constant 0 : i32
    %c0_i32_0 = arith.constant 0 : i32
    %c0_i32_1 = arith.constant 0 : i32
    return %arg1, %c0_i32, %c0_i32_0 : i32, i32, i32
  }
  func.func @transform_17(%arg0: i32, %arg1: i32) -> (i32, i32) {
    %c0_i32 = arith.constant 0 : i32
    %c0_i32_0 = arith.constant 0 : i32
    %c0_i32_1 = arith.constant 0 : i32
    return %c0_i32, %c0_i32_0 : i32, i32
  }
  func.func @transform_18(%arg0: i32, %arg1: i32) -> (i32, i32) {
    %c0_i32 = arith.constant 0 : i32
    %c0_i32_0 = arith.constant 0 : i32
    %c0_i32_1 = arith.constant 0 : i32
    return %c0_i32, %c0_i32_0 : i32, i32
  }
  func.func @transform_19(%arg0: i32, %arg1: i32) -> (i32, i32) {
    %c0_i32 = arith.constant 0 : i32
    %c0_i32_0 = arith.constant 0 : i32
    %c0_i32_1 = arith.constant 0 : i32
    return %c0_i32, %c0_i32_0 : i32, i32
  }
  func.func @transform_20(%arg0: i32, %arg1: i32) -> (i32, i32, i32) {
    %c0_i32 = arith.constant 0 : i32
    %c0_i32_0 = arith.constant 0 : i32
    %c0_i32_1 = arith.constant 0 : i32
    return %arg0, %c0_i32, %c0_i32_0 : i32, i32, i32
  }
}

</mosaic_0001>

<bundles_post_ra>
// kernel: tpu_custom_call.1
= control target key start
LH: loop header
LB: loop body
LE: loop exit
PB: predicated region body
PF: predicated region fallthrough
CT: control target
= control target key end

     0   :  { %s3111_s0 = inlined_call_operand.vmem [shape: f32[2,8,32], index: 0, kind: input, shape index: {}]   ;;  %s3112_s1 = inlined_call_operand.vmem [shape: f32[2,1,32], index: 1, kind: input, shape index: {}]   ;;  %s3113_s2 = inlined_call_operand.vmem [shape: f32[2,1,32], index: 2, kind: input, shape index: {}]   ;;  %s3114_s3 = inlined_call_operand.vmem [shape: bf16[2,4,32,8], index: 3, kind: input, shape index: {}]   ;;  %s3115_s4 = inlined_call_operand.vmem [shape: bf16[2,4,32,8], index: 4, kind: input, shape index: {}]   ;;  %s3116_s5 = inlined_call_operand.vmem [shape: bf16[2,4,32,8], index: 5, kind: input, shape index: {}]   ;;  %s3117_s6 = inlined_call_operand.vmem [shape: f32[2,4,1,8], index: 6, kind: input, shape index: {}]   ;;  %s3118_s7 = inlined_call_operand.vmem [shape: f32[2,4,1,8], index: 7, kind: input, shape index: {}]   ;;  %s3119_s8 = inlined_call_operand.vmem [shape: f32[2,4,1,8], index: 8, kind: input, shape index: {}]   ;;  %s3120_s9 = inlined_call_operand.vmem [shape: bf16[2,4,8,32], index: 9, kind: input, shape index: {}]   ;;  %s3121_s10 = inlined_call_operand.vmem [shape: f32[2,1,32], index: 10, kind: input, shape index: {}]   ;;  %s3122_s11 = inlined_call_operand.vmem [shape: f32[2,1,32], index: 11, kind: input, shape index: {}]   ;;  %s3123_s12 = inlined_call_operand.vmem [shape: f32[2,1,32], index: 12, kind: input, shape index: {}]   ;;  %s3124_s13 = inlined_call_operand.vmem [shape: bf16[2,32,128], index: 13, kind: input, shape index: {}]   ;;  %s3125_s14 = inlined_call_operand.vmem [shape: f32[2,1,128], index: 14, kind: input, shape index: {}]   ;;  %s3126_s15 = inlined_call_operand.vmem [shape: bf16[2,128,32], index: 15, kind: input, shape index: {}]   ;;  %s3127_s16 = inlined_call_operand.vmem [shape: f32[2,1,32], index: 16, kind: input, shape index: {}]   ;;  %s3128_s17 = inlined_call_operand.vmem [shape: f32[1,32], index: 17, kind: input, shape index: {}]   ;;  %s3129_s18 = inlined_call_operand.vmem [shape: f32[1,32], index: 18, kind: input, shape index: {}]   ;;  %s3130_s19 = inlined_call_operand.vmem [shape: bf16[32,128], index: 19, kind: input, shape index: {}]   ;;  %s3131_s20 = inlined_call_operand.hbm [shape: f32[2,8,128], index: 20, kind: output, shape index: {}]  }
   0x1   :  { %3150 = sst [smem:[#allocation21_spill]] %s3111_s0 }
   0x2   :  { %3151 = sst [smem:[#allocation22_spill]] %s3112_s1 }
   0x3   :  { %3152 = sst [smem:[#allocation23_spill]] %s3113_s2 }
   0x4   :  { %3153 = sst [smem:[#allocation24_spill]] %s3114_s3 }
   0x5   :  { %3154 = sst [smem:[#allocation25_spill]] %s3115_s4 }
   0x6   :  { %3155 = sst [smem:[#allocation26_spill]] %s3116_s5 }
   0x7   :  { %3156 = sst [smem:[#allocation27_spill]] %s3117_s6 }
   0x8   :  { %3157 = sst [smem:[#allocation28_spill]] %s3118_s7 }
   0x9   :  { %3158 = sst [smem:[#allocation29_spill]] %s3119_s8 }
   0xa   :  { %3159 = sst [smem:[#allocation30_spill]] %s3120_s9 }
   0xb   :  { %3160 = sst [smem:[#allocation31_spill]] %s3122_s11 }
   0xc   :  { %3161 = sst [smem:[#allocation32_spill]] %s3126_s15 }
   0xd   :  { %3162 = sst [smem:[#allocation33_spill]] %s3127_s16 }
   0xe   :  { %3163 = sst [smem:[#allocation34_spill]] %s3128_s17 }
   0xf   :  { %3164 = sst [smem:[#allocation35_spill]] %s3129_s18 }
  0x10   :  { %3165 = sst [smem:[#allocation36_spill]] %s3130_s19 }
  0x11   :  { %3166 = sst [smem:[#allocation37_spill]] %s3131_s20 }
  0x12   :  { %25 = vsyncpa [#allocation4], 0 }
  0x13   :  { %27 = vsyncpa [#allocation4 + $0x1], 0  ;;  %s2729_s1 = smov 0   ;;  %s2731_s22 = smov 0  }
  0x14   :  { %s2733_s23 = smov 0   ;;  %s2735_s24 = smov 0  }
  0x15   :  { %s2737_s2 = smov 0   ;;  %s2739_s25 = smov 0  }
  0x16   :  { %s2741_s3 = smov 0   ;;  %s2743_s26 = smov 0  }
  0x17 LB: > { %3167 = sst [smem:[#allocation6_spill]] %s2592_s1  ;;  %s2166_s27 = sadd.s32 4294967295, %s2620_s26   ;;  %s2620_s26 = sphi %s2743_s26, %s33_s26   ;;  %s2616_s3 = sphi %s2741_s3, %s3226_s3   ;;  %s2612_s25 = sphi %s2739_s25, %s3225_s25   ;;  %s2608_s2 = sphi %s2737_s2, %s3224_s2   ;;  %s2604_s24 = sphi %s2735_s24, %s3223_s24   ;;  %s2600_s23 = sphi %s2733_s23, %s3222_s23   ;;  %s2596_s22 = sphi %s2731_s22, %s3221_s22   ;;  %s2592_s1 = sphi %s2729_s1, %s3220_s1  }
  0x18   : > { %3168 = sst [smem:[#allocation7_spill]] %s2596_s22  ;;  %s2167_s28 = sadd.s32 4294967294, %s2620_s26  }
  0x19   : > { %3169 = sst [smem:[#allocation8_spill]] %s2600_s23  ;;  %s42_s4 = sadd.s32 1, %s2612_s25 }
  0x1a   : > { %3170 = sst [smem:[#allocation9_spill]] %s2604_s24  ;;  %p43_p0 = scmp.ge.s32.totalorder %s42_s4, 2 }
  0x1b   : > { %3171 = sst [smem:[#allocation10_spill]] %s2608_s2  ;;  %s45_s29 = sadd.s32 1, %s2616_s3 }
  0x1c   : > { %3172 = sst [smem:[#allocation11_spill]] %s2612_s25  ;;  %p567_p1 = scmp.ne.s32.totalorder %s2600_s23, %s2596_s22 }
  0x1d   : > { %3173 = sst [smem:[#allocation12_spill]] %s2616_s3  ;;  %p568_p2 = scmp.eq.s32.totalorder %s2166_s27, 3 }
  0x1e   : > { %3174 = sst [smem:[#allocation13_spill]] %s2620_s26  ;;  %s3228_s4 = smov (%p43_p0, %s42_s4), 0 }
  0x1f   : > { %3175 = sst [smem:[#allocation14_spill]] %s3228_s4  ;;  %s3230_s29 = smov (!%p43_p0, %s45_s29), %s2616_s3 }
  0x20   : > { %p2778_p3 = por %p568_p2, %p567_p1  ;;  %p573_p4 = scmp.ne.s32.totalorder %s2596_s22, %s2592_s1 }
  0x21   : > { %p47_p5 = scmp.ge.s32.totalorder %s3230_s29, 2  ;;  %p574_p6 = scmp.eq.s32.totalorder %s2167_s28, 3 }
  0x22   : > { %s3176_s30 = scalar_select %p2778_p3, 1, 0 }
  0x23   : > { %p2170_p7 = scmp.ge.s32.totalorder %s2620_s26, 1  ;;  %p719_p8 = scmp.lt.s32.totalorder %s2620_s26, 5 }
  0x24   : > { %3177 = sst [smem:[#allocation15_spill]] %s3176_s30  ;;  %s3232_s29 = smov (%p47_p5, %s3230_s29), 0 }
  0x25   : > { %3178 = sst [smem:[#allocation16_spill]] %s3232_s29  ;;  %p2788_p9 = por %p574_p6, %p573_p4 }
  0x26   : > { %p720_p10 = pnand %p2170_p7, %p719_p8  ;;  %s554_s21 = ssub.s32 %s2616_s3, %s3232_s29 }
  0x27   : > { %s3179_s0 = scalar_select %p2788_p9, 1, 0 }
  0x28   : > { %s557_s27 = sadd.s32 1, %s2600_s23  ;;  %p555_p11 = scmp.eq.s32.totalorder %s554_s21, 0 }
  0x29   : > { %3180 = sst [smem:[#allocation17_spill]] %s3179_s0  ;;  %723 = sbr.rel (%p720_p10) target bundleno = 2184 (0x888), region = 100 }
  0x2a   : > { %s2796_s4 = scalar_select %p555_p11, %s2600_s23, %s557_s27  }
  0x2c   : > { %3181 = sst [smem:[#allocation18_spill]] %s2796_s4 }
  0x2e   : > { %s3138_s28 = sand.u32 1, %s2596_s22   ;;  %p839_p12 = scmp.lt.s32.totalorder %s2608_s2, 1 }
  0x2f   : > { %s2802_s25 = sshll.u32 %s3138_s28, 3  ;;  %p843_p13 = scmp.lt.s32.totalorder %s2604_s24, 1 }
  0x30   : > { %s840_s0 = scalar_select %p839_p12, %s2608_s2, 1 }
  0x31   : > { %s2807_s1 = scalar_select %p843_p13, %s2604_s24, 1 }
  0x32   : > { %s2172_s21 = sshll.u32 %s840_s0, 3  ;;  %s3182_s3 = sld [smem:[#allocation21_spill]] }
  0x33   : > { %s2364_s17 = sshll.u32 %s2807_s1, 6  ;;  %s3185_s16 = sld [smem:[#allocation24_spill]] }
  0x34   : > { %s3186_s27 = sld [smem:[#allocation25_spill]]  ;;  %s2179_s22 = sshll.u32 %s2807_s1, 2 }
  0x35   : > { %s3187_s5 = sld [smem:[#allocation26_spill]]  ;;  %s2367_s18 = sshll.u32 %s2807_s1, 4 }
  0x36   : > { %s3188_s6 = sld [smem:[#allocation27_spill]]  ;;  %s889_s15 = scalar_lea.vmem %s3123_s12, %s2807_s1 }
  0x37   : > { %s3190_s7 = sld [smem:[#allocation28_spill]] }
  0x38   : > { %s842_s4 = scalar_lea.vmem %s3182_s3, %s2172_s21  ;;  %s3191_s8 = sld [smem:[#allocation29_spill]] }
  0x39   : > { %s2824_s0 = scalar_lea.vmem %s3185_s16, %s2364_s17  ;;  %s3192_s9 = sld [smem:[#allocation30_spill]] }
  0x3a   : > { %s2829_s3 = scalar_lea.vmem %s3186_s27, %s2364_s17  ;;  %s3195_s2 = sld [smem:[#allocation32_spill]] }
  0x3b   : > { %s2834_s28 = scalar_lea.vmem %s3187_s5, %s2364_s17  ;;  %s3196_s19 = sld [smem:[#allocation33_spill]] }
  0x3c   : > { %s2840_s21 = scalar_lea.vmem %s3188_s6, %s2179_s22  ;;  %s3197_s16 = sld [smem:[#allocation9_spill]] }
  0x3d   : > { %3189 = sst [smem:[#allocation19_spill]] %s2840_s21  ;;  %s2845_s24 = scalar_lea.vmem %s3190_s7, %s2179_s22 }
  0x3e   : > { %s2850_s27 = scalar_lea.vmem %s3191_s8, %s2179_s22  ;;  %s2873_s8 = scalar_lea.vmem %s3124_s13, %s2367_s18 }
  0x3f   : > { %s2856_s20 = scalar_lea.vmem %s3192_s9, %s2367_s18  ;;  %s897_s9 = scalar_lea.vmem %s3125_s14, %s2807_s1 }
  0x40   : > { %3193 = sst [smem:[#allocation20_spill]] %s2856_s20  ;;  %s2882_s30 = scalar_lea.vmem %s3195_s2, %s2364_s17 }
  0x41   : > { %s905_s11 = scalar_lea.vmem %s3196_s19, %s2807_s1  ;;  %s838_s7 = scalar_lea.vmem [#allocation3], %s2802_s25 }
  0x42   : > { %p2188_p0 = scmp.ne.s32.totalorder %s3197_s16, 0 }
  0x44   : > { %910 = sbr.rel (%p2188_p0) target bundleno = 75 (0x4b), region = 104 }
  0x49   : > { %v911_v0 = vld [vmem:[%s842_s4] sm:$0xff]  ;;  %vm912_vm0 = vcmask 261120  }
  0x4a   : > { %913 = vst.msk [vmem:[#allocation2] sm:$0xff] %vm912_vm0, %v911_v0 }
  0x4b PF: > { %vm917_vm1 = vcmask 261120   ;;  %v2622_v3 = vmov 32.0   ;;  %v2371_v15 = vld [vmem:[%s2824_s0 + $0x8] sm:$0xff]  ;;  %v2373_v16 = vld [vmem:[%s2824_s0 + $0x18] sm:$0xff]  ;;  %v2370_v19 = vld [vmem:[%s2824_s0] sm:$0xff]  ;;  %s3198_s20 = sld [smem:[#allocation22_spill]] }
  0x4c   : > { %2498 = vrcp.f32 %v2622_v3  ;;  %v2377_v17 = vld [vmem:[%s2824_s0 + $0x38] sm:$0xff]  ;;  %1009 = vmatpush.bf16.msra.mxu0 %v2371_v15  ;;  %1034 = vmatpush.bf16.msra.mxu2 %v2373_v16  ;;  %v2372_v20 = vld [vmem:[%s2824_s0 + $0x10] sm:$0xff]  ;;  %v2375_v24 = vld [vmem:[%s2824_s0 + $0x28] sm:$0xff]  ;;  %s3200_s22 = sld [smem:[#allocation23_spill]]  ;;  %vm1373_vm6 = vcmask 64512   ;;  %vm1505_vm7 = vcmask 1043456  }
  0x4d   : > { %v2381_v18 = vld [vmem:[%s2829_s3 + $0x18] sm:$0xff]  ;;  %1084 = vmatpush.bf16.msra.mxu3 %v2377_v17  ;;  %v2376_v21 = vld [vmem:[%s2824_s0 + $0x30] sm:$0xff]  ;;  %v2379_v25 = vld [vmem:[%s2829_s3 + $0x8] sm:$0xff]  ;;  %s3202_s23 = sld [smem:[#allocation19_spill]] }
  0x4e   : > { %1166 = vmatpush.bf16.msra.mxu1 %v2381_v18  ;;  %v2380_v22 = vld [vmem:[%s2829_s3 + $0x10] sm:$0xff]  ;;  %v2385_v26 = vld [vmem:[%s2829_s3 + $0x38] sm:$0xff]  ;;  %v2374_v29 = vld [vmem:[%s2824_s0 + $0x20] sm:$0xff]  ;;  %s3205_s5 = sld [smem:[#allocation31_spill]] }
  0x4f   : > { %v2389_v28 = vld [vmem:[%s2834_s28 + $0x18] sm:$0xff]  ;;  %v2378_v30 = vld [vmem:[%s2829_s3] sm:$0xff]  ;;  %v2384_v32 = vld [vmem:[%s2829_s3 + $0x30] sm:$0xff] }
  0x50   : > { %1010 = vmatpush.bf16.msra.mxu0 %v2370_v19  ;;  %1035 = vmatpush.bf16.msra.mxu2 %v2372_v20  ;;  %v2388_v33 = vld [vmem:[%s2834_s28 + $0x10] sm:$0xff]  ;;  %v2383_v47 = vld [vmem:[%s2829_s3 + $0x28] sm:$0xff]  ;;  %v2393_v49 = vld [vmem:[%s2834_s28 + $0x38] sm:$0xff] }
  0x51   : > { %v2890_v1 = vld [vmem:[#allocation2] sm:$0xff]  ;;  %1085 = vmatpush.bf16.msra.mxu3 %v2376_v21  ;;  %s3199_s4 = scalar_lea.vmem %s3198_s20, %s2807_s1  ;;  %v2387_v48 = vld [vmem:[%s2834_s28 + $0x8] sm:$0xff]  ;;  %v2392_v52 = vld [vmem:[%s2834_s28 + $0x30] sm:$0xff] }
  0x52   : > { %v918_v2 = vsel %vm917_vm1, %v2890_v1, 0.0  ;;  %v2499_v4 = vpop.eup %2498  ;;  %1167 = vmatpush.bf16.msra.mxu1 %v2380_v22  ;;  %v2479_v40 = vld [vmem:[%s3199_s4] ss:$0 sm:$0xff]  ;;  %s3201_s29 = scalar_lea.vmem %s3200_s22, %s2807_s1  ;;  %v2391_v53 = vld [vmem:[%s2834_s28 + $0x28] sm:$0xff]  ;;  %v2482_v55 = vld [vmem:[%s2845_s24 + $0x1] ss:$0 sm:$0xff] }
  0x53   : > { %919 = vadd.xlane.f32.xlu0 %v918_v2  ;;  %v922_v5 = vmul.f32 32.0, %v2499_v4  ;;  %vm926_vm2 = vweird.f32 %v2499_v4  ;;  %v2480_v42 = vld [vmem:[%s3201_s29] ss:$0 sm:$0xff]  ;;  %v2483_v59 = vld [vmem:[%s3202_s23 + $0x1] ss:$0 sm:$0xff] }
  0x54   : > { %1059 = vmatpush.bf16.msrb.mxu2 %v2375_v24  ;;  %1141 = vmatpush.bf16.msrb.mxu0 %v2379_v25  ;;  %v2382_v50 = vld [vmem:[%s2829_s3 + $0x20] sm:$0xff]  ;;  %s3203_s3 = sld [smem:[#allocation20_spill]]  ;;  %s3206_s2 = scalar_lea.vmem %s3205_s5, %s2807_s1 }
  0x55   : > { %v923_v6 = vsub.f32 1.0, %v922_v5  ;;  %1216 = vmatpush.bf16.msrb.mxu3 %v2385_v26  ;;  %v2386_v51 = vld [vmem:[%s2834_s28] sm:$0xff] }
  0x56   : > { %1298 = vmatpush.bf16.msrb.mxu1 %v2389_v28  ;;  %v2390_v54 = vld [vmem:[%s2834_s28 + $0x20] sm:$0xff] }
  0x57   : > { %v924_v7 = vmul.f32 %v2499_v4, %v923_v6  ;;  %v2485_v6 = vld [vmem:[%s2845_s24] ss:$0 sm:$0xff]  ;;  %v2488_v19 = vld [vmem:[%s2845_s24 + $0x3] ss:$0 sm:$0xff] }
  0x58   : > { %1060 = vmatpush.bf16.msrb.mxu2 %v2374_v29  ;;  %1142 = vmatpush.bf16.msrb.mxu0 %v2378_v30  ;;  %v2484_v21 = vld [vmem:[%s3202_s23 + $0x3] ss:$0 sm:$0xff] }
  0x59   : > { %v925_v8 = vadd.f32 %v2499_v4, %v924_v7  ;;  %1217 = vmatpush.bf16.msrb.mxu3 %v2384_v32 }
  0x5a   : > { %1299 = vmatpush.bf16.msrb.mxu1 %v2388_v33  ;;  %v2489_v33 = vld [vmem:[%s2850_s27] ss:$0 sm:$0xff] }
  0x5b   : > { %v2894_v9 = vsel %vm926_vm2, %v2499_v4, %v925_v8  ;;  %v2486_v8 = vld [vmem:[%s2850_s27 + $0x1] ss:$0 sm:$0xff] }
  0xc6   : > { %v920_v10 = vpop.xlane.xlu0 %919 }
  0xc7   : > { %v928_v11 = vmul.f32 %v2894_v9, %v920_v10  ;;  %v2481_v10 = vld [vmem:[%s3202_s23] ss:$0 sm:$0xff] }
  0xc9   : > { %v929_v12 = vsub.f32 %v2890_v1, %v928_v11 }
  0xcb   : > { %v930_v13 = vmul.f32 %v929_v12, %v929_v12 }
  0xcd   : > { %v931_v14 = vsel %vm917_vm1, %v930_v13, 0.0 }
  0xce   : > { %932 = vadd.xlane.f32.xlu0 %v931_v14 }
 0x141   : > { %v933_v23 = vpop.xlane.xlu0 %932 }
 0x142   : > { %v934_v27 = vmul.f32 %v933_v23, %v2894_v9 }
 0x144   : > { %v935_v31 = vadd.f32 1e-05, %v934_v27 }
 0x146   : > { %2500 = vrsqrt.f32 %v935_v31  ;;  %vm942_vm4 = vweird.f32 %v935_v31 }
 0x14c   : > { %v2501_v34 = vpop.eup %2500 }
 0x14d   : > { %v937_v35 = vmul.f32 %v2501_v34, %v935_v31  ;;  %vm943_vm3 = vweird.f32 %v2501_v34 }
 0x14e   : > { %vm944_vm5 = vmor %vm942_vm4, %vm943_vm3 }
 0x14f   : > { %v938_v36 = vmul.f32 %v2501_v34, %v937_v35 }
 0x151   : > { %v939_v37 = vmul.f32 0.5, %v938_v36 }
 0x153   : > { %v940_v38 = vsub.f32 1.5, %v939_v37 }
 0x155   : > { %v941_v39 = vmul.f32 %v2501_v34, %v940_v38 }
 0x157   : > { %v945_v41 = vsel %vm944_vm5, %v2501_v34, %v941_v39 }
 0x158   : > { %v946_v43 = vmul.f32 %v945_v41, %v929_v12  ;;  %v2490_v41 = vld [vmem:[%s2845_s24 + $0x2] ss:$0 sm:$0xff] }
 0x15a   : > { %v950_v44 = vmul.f32 %v2479_v40, %v946_v43  ;;  %v2487_v43 = vld [vmem:[%s3202_s23 + $0x2] ss:$0 sm:$0xff] }
 0x15c   : > { %v954_v45 = vadd.f32 %v2480_v42, %v950_v44  ;;  %v2491_v42 = vld [vmem:[%s2850_s27 + $0x3] ss:$0 sm:$0xff] }
 0x15e   : > { %v955_v46 = vpack.c.bf16 %v954_v45, %v954_v45 }
 0x160   : > { %2197 = vmatmul.msk.bf16.vlgmr.msra.gmra.mxu0 %vm917_vm1, %v955_v46  ;;  %2206 = vmatmul.msk.bf16.vlgmr.msra.gmra.mxu2 %vm917_vm1, %v955_v46 }
 0x161   : > { %2224 = vmatmul.msk.bf16.vlgmr.msra.gmra.mxu3 %vm917_vm1, %v955_v46  ;;  %2242 = vmatmul.msk.bf16.vlgmr.msra.gmra.mxu1 %vm917_vm1, %v955_v46 }
 0x162   : > { %1191 = vmatpush.bf16.msra.mxu2 %v2383_v47  ;;  %1273 = vmatpush.bf16.msra.mxu0 %v2387_v48 }
 0x163   : > { %1348 = vmatpush.bf16.msra.mxu3 %v2393_v49 }
 0x166   : > { %1192 = vmatpush.bf16.msra.mxu2 %v2382_v50  ;;  %1274 = vmatpush.bf16.msra.mxu0 %v2386_v51 }
 0x167   : > { %1349 = vmatpush.bf16.msra.mxu3 %v2392_v52 }
 0x170   : > { %2215 = vmatmul.msk.bf16.vlgmr.msrb.gmra.mxu2 %vm917_vm1, %v955_v46  ;;  %2233 = vmatmul.msk.bf16.vlgmr.msrb.gmra.mxu0 %vm917_vm1, %v955_v46 }
 0x171   : > { %2260 = vmatmul.msk.bf16.vlgmr.msrb.gmra.mxu3 %vm917_vm1, %v955_v46  ;;  %2278 = vmatmul.msk.bf16.vlgmr.msrb.gmra.mxu1 %vm917_vm1, %v955_v46 }
 0x172   : > { %1323 = vmatpush.bf16.msrb.mxu2 %v2391_v53 }
 0x176   : > { %1324 = vmatpush.bf16.msrb.mxu2 %v2390_v54 }
 0x180   : > { %2251 = vmatmul.msk.bf16.vlgmr.msra.gmra.mxu2 %vm917_vm1, %v955_v46  ;;  %2269 = vmatmul.msk.bf16.vlgmr.msra.gmra.mxu0 %vm917_vm1, %v955_v46 }
 0x181   : > { %2296 = vmatmul.msk.bf16.vlgmr.msra.gmra.mxu3 %vm917_vm1, %v955_v46 }
 0x190   : > { %2287 = vmatmul.msk.bf16.vlgmr.msrb.gmra.mxu2 %vm917_vm1, %v955_v46 }
 0x1dd   : > { %v1012_v56 = vpop.f32.mrf.mxu0 }
 0x1de   : > { %v1169_v57 = vpop.f32.mrf.mxu1  ;;  %v1013_v16 = vadd.f32 %v2481_v10, %v1012_v56 }
 0x1df   : > { %v1170_v58 = vadd.f32 %v2482_v55, %v1169_v57 }
 0x1e0   : > { %v1355_v24 = vmul.f32 0.35355338, %v1013_v16 }
 0x1e1   : > { %v1370_v60 = vpack.c.bf16 %v1170_v58, %v1170_v58 }
 0x1e2   : > { %v1365_v31 = vpack.c.bf16 %v1355_v24, %v1355_v24 }
 0x1e3   : > { %v1397_v61 = vsel %vm1373_vm6, %v1370_v60, 0  ;;  %v1037_v62 = vpop.f32.mrf.mxu2 }
 0x1e4   : > { %v1038_v63 = vadd.f32 %v2483_v59, %v1037_v62  ;;  %v1087_v0 = vpop.f32.mrf.mxu3  ;;  %1406 = vmatpush.bf16.xpose.msra.mxu1 %v1397_v61  ;;  %v2492_v59 = vld [vmem:[%s2850_s27 + $0x2] ss:$0 sm:$0xff]  ;;  %s3204_s27 = scalar_lea.vmem %s3121_s10, %s2807_s1 }
 0x1e5   : > { %v1014_v2 = vpop.f32.mrf.mxu0  ;;  %v1088_v29 = vadd.f32 %v2484_v21, %v1087_v0 }
 0x1e6   : > { %v1356_v3 = vmul.f32 0.35355338, %v1038_v63  ;;  %v1171_v4 = vpop.f32.mrf.mxu1 }
 0x1e7   : > { %v1358_v34 = vmul.f32 0.35355338, %v1088_v29 }
 0x1e8   : > { %v1366_v5 = vpack.c.bf16 %v1356_v3, %v1356_v3  ;;  %v1359_v3 = vlaneseq }
 0x1e9   : > { %v1368_v39 = vpack.c.bf16 %v1358_v34, %v1358_v34 }
 0x1ea   : > { %v1360_v4 = vshrl.u32 %v1359_v3, 7 }
 0x1eb   : > { %2298 = vmatmul.msk.bf16.vlgmr.msra.gmra.mxu1 %vm1373_vm6, %v1366_v5  ;;  %v1039_v7 = vpop.f32.mrf.mxu2  ;;  %v1362_v5 = vand.u32 127, %v1359_v3  ;;  %v1584_v3 = vld [vmem:[%s3203_s3 + $0x4] sm:$0xf] }
 0x1ec   : > { %v1089_v11 = vpop.f32.mrf.mxu3  ;;  %v2623_v7 = vmov -1e+30  }
 0x1ed   : > { %v1144_v12 = vpop.f32.mrf.mxu0  ;;  %vm1363_vm8 = vcmp.le.s32.totalorder %v1362_v5, %v1360_v4  ;;  %v1610_v4 = vsel %vm1505_vm7, %v1584_v3, 0  ;;  %v1586_v5 = vld [vmem:[%s3203_s3 + $0xc] sm:$0xf]  ;;  %v2396_v3 = vld [vmem:[%s2882_s30] sm:$0xff] }
 0x1ee   : > { %v1145_v13 = vadd.f32 %v2485_v6, %v1144_v12  ;;  %v1301_v14 = vpop.f32.mrf.mxu1 }
 0x1ef   : > { %v1302_v15 = vadd.f32 %v2486_v8, %v1301_v14  ;;  %v1364_v8 = vsel %vm1363_vm8, 0.0, %v2623_v7 }
 0x1f0   : > { %v1369_v17 = vpack.c.bf16 %v1145_v13, %v1145_v13 }
 0x1f1   : > { %v1499_v18 = vpack.c.bf16 %v1302_v15, %v1302_v15 }
 0x1f2   : > { %v1378_v20 = vsel %vm1373_vm6, %v1369_v17, 0 }
 0x1f3   : > { %v1526_v22 = vsel %vm1505_vm7, %v1499_v18, 0  ;;  %v1062_v23 = vpop.f32.mrf.mxu2  ;;  %1387 = vmatpush.bf16.xpose.msrb.mxu0 %v1378_v20 }
 0x1f4   : > { %v1219_v25 = vpop.f32.mrf.mxu3  ;;  %1535 = vmatpush.bf16.msrb.mxu1 %v1526_v22  ;;  %v1063_v50 = vadd.f32 %v2487_v43, %v1062_v23 }
 0x1f5   : > { %v1220_v26 = vadd.f32 %v2488_v19, %v1219_v25  ;;  %v1146_v27 = vpop.f32.mrf.mxu0 }
 0x1f6   : > { %v1303_v28 = vpop.f32.mrf.mxu1  ;;  %v1357_v55 = vmul.f32 0.35355338, %v1063_v50 }
 0x1f7   : > { %v1372_v30 = vpack.c.bf16 %v1220_v26, %v1220_v26 }
 0x1f8   : > { %v1367_v58 = vpack.c.bf16 %v1357_v55, %v1357_v55  ;;  %1619 = vmatpush.bf16.msra.mxu1 %v1610_v4  ;;  %v2496_v4 = vld [vmem:[%s897_s9] ss:$0 sm:$0xff]  ;;  %s3208_s9 = sld [smem:[#allocation9_spill]] }
 0x1f9   : > { %v1435_v32 = vsel %vm1373_vm6, %v1372_v30, 0 }
 0x1fa   : > { %1444 = vmatpush.bf16.xpose.msrb.mxu3 %v1435_v32  ;;  %2297 = vmatmul.msk.bf16.vlgmr.msrb.gmra.mxu0 %vm1373_vm6, %v1365_v31 }
 0x1fb   : > { %v1064_v35 = vpop.f32.mrf.mxu2 }
 0x1fc   : > { %v1221_v36 = vpop.f32.mrf.mxu3 }
 0x1fd   : > { %v1276_v37 = vpop.f32.mrf.mxu0 }
 0x1fe   : > { %v1277_v38 = vadd.f32 %v2489_v33, %v1276_v37  ;;  %p2350_p1 = scmp.ne.s32.totalorder %s3208_s9, 1 }
 0x1ff   : > { %s3209_s20 = sld [smem:[#allocation36_spill]] (!%p2350_p1) }
 0x200   : > { %v1498_v40 = vpack.c.bf16 %v1277_v38, %v1277_v38  ;;  %s3210_s29 = sld [smem:[#allocation34_spill]] (!%p2350_p1) }
 0x201   : > { %2300 = vmatmul.msk.bf16.vlgmr.msrb.gmra.mxu3 %vm1373_vm6, %v1368_v39  ;;  %s3211_s28 = sld [smem:[#allocation35_spill]] (!%p2350_p1) }
 0x202   : > { %v1507_v44 = vsel %vm1505_vm7, %v1498_v40, 0 }
 0x203   : > { %v1194_v45 = vpop.f32.mrf.mxu2  ;;  %1516 = vmatpush.bf16.msra.mxu0 %v1507_v44 }
 0x204   : > { %v1195_v46 = vadd.f32 %v2490_v41, %v1194_v45  ;;  %v1351_v47 = vpop.f32.mrf.mxu3 }
 0x205   : > { %v1352_v48 = vadd.f32 %v2491_v42, %v1351_v47  ;;  %v1278_v49 = vpop.f32.mrf.mxu0 }
 0x206   : > { %v1371_v51 = vpack.c.bf16 %v1195_v46, %v1195_v46 }
 0x207   : > { %v1501_v52 = vpack.c.bf16 %v1352_v48, %v1352_v48 }
 0x208   : > { %v1416_v53 = vsel %vm1373_vm6, %v1371_v51, 0 }
 0x209   : > { %v1564_v54 = vsel %vm1505_vm7, %v1501_v52, 0  ;;  %1425 = vmatpush.bf16.xpose.msra.mxu2 %v1416_v53 }
 0x20a   : > { %1573 = vmatpush.bf16.msra.mxu3 %v1564_v54 }
 0x20b   : > { %v1196_v56 = vpop.f32.mrf.mxu2 }
 0x20c   : > { %v1353_v57 = vpop.f32.mrf.mxu3 }
 0x210   : > { %2299 = vmatmul.msk.bf16.vlgmr.msra.gmra.mxu2 %vm1373_vm6, %v1367_v58 }
 0x213   : > { %v1326_v60 = vpop.f32.mrf.mxu2 }
 0x214   : > { %v1327_v61 = vadd.f32 %v2492_v59, %v1326_v60  ;;  %v1583_v60 = vld [vmem:[%s3203_s3] sm:$0xf] }
 0x216   : > { %v1500_v62 = vpack.c.bf16 %v1327_v61, %v1327_v61  ;;  %v1591_v61 = vsel %vm1505_vm7, %v1583_v60, 0 }
 0x217   : > { %1600 = vmatpush.bf16.msrb.mxu0 %v1591_v61  ;;  %v2401_v61 = vld [vmem:[%s2882_s30 + $0x28] sm:$0xff] }
 0x218   : > { %v1545_v63 = vsel %vm1505_vm7, %v1500_v62, 0 }
 0x219   : > { %1554 = vmatpush.bf16.msrb.mxu2 %v1545_v63 }
 0x21b   : > { %v1328_v0 = vpop.f32.mrf.mxu2 }
 0x21c   : > { %v1585_v0 = vld [vmem:[%s3203_s3 + $0x8] sm:$0xf] }
 0x268   : > { %v1408_v2 = vpop.f32.mrf.mxu1 }
 0x269   : > { %v1409_v13 = vadd.f32 %v1408_v2, %v1364_v8  ;;  %v1629_v2 = vsel %vm1505_vm7, %v1585_v0, 0  ;;  %v2398_v0 = vld [vmem:[%s2882_s30 + $0x10] sm:$0xff] }
 0x26a   : > { %1638 = vmatpush.bf16.msra.mxu2 %v1629_v2  ;;  %v2397_v2 = vld [vmem:[%s2882_s30 + $0x8] sm:$0xff] }
 0x26b   : > { %v1453_v15 = vsel %vm1373_vm6, %v1409_v13, -inf }
 0x270   : > { %v1410_v6 = vpop.f32.mrf.mxu1 }
 0x271   : > { %v1648_v6 = vsel %vm1505_vm7, %v1586_v5, 0 }
 0x272   : > { %1657 = vmatpush.bf16.msrb.mxu3 %v1648_v6 }
 0x277   : > { %v1389_v10 = vpop.f32.mrf.mxu0 }
 0x278   : > { %v1390_v11 = vadd.f32 %v1389_v10, %v1364_v8 }
 0x27a   : > { %v1450_v12 = vsel %vm1373_vm6, %v1390_v11, -inf }
 0x27b   : > { %1451 = vmax.xlane.f32.xlu2 %v1450_v12 }
 0x27f   : > { %v1391_v14 = vpop.f32.mrf.mxu0 }
 0x283   : > { %1454 = vmax.xlane.f32.xlu2 %v1453_v15 }
 0x284   : > { %v1446_v16 = vpop.f32.mrf.mxu3 }
 0x285   : > { %v1447_v21 = vadd.f32 %v1446_v16, %v1364_v8 }
 0x287   : > { %v1459_v23 = vsel %vm1373_vm6, %v1447_v21, -inf }
 0x28c   : > { %v1448_v17 = vpop.f32.mrf.mxu3 }
 0x293   : > { %v1427_v18 = vpop.f32.mrf.mxu2 }
 0x294   : > { %v1428_v19 = vadd.f32 %v1427_v18, %v1364_v8 }
 0x296   : > { %v1456_v20 = vsel %vm1373_vm6, %v1428_v19, -inf }
 0x297   : > { %1457 = vmax.xlane.f32.xlu1 %v1456_v20 }
 0x29b   : > { %v1429_v22 = vpop.f32.mrf.mxu2 }
 0x29f   : > { %1460 = vmax.xlane.f32.xlu1 %v1459_v23 }
 0x2ee   : > { %v1452_v24 = vpop.xlane.xlu2 %1451 }
 0x2ef   : > { %v1462_v25 = vsub.f32 %v1390_v11, %v1452_v24 }
 0x2f1   : > { %v1466_v26 = vmul.f32 1.442695, %v1462_v25 }
 0x2f3   : > { %2502 = vpow2.f32 %v1466_v26 }
 0x2f6   : > { %v1455_v29 = vpop.xlane.xlu2 %1454 }
 0x2f7   : > { %v1463_v32 = vsub.f32 %v1409_v13, %v1455_v29 }
 0x2f9   : > { %v2503_v27 = vpop.eup %2502  ;;  %v1468_v34 = vmul.f32 1.442695, %v1463_v32 }
 0x2fa   : > { %v1474_v28 = vsel %vm1373_vm6, %v2503_v27, 0.0 }
 0x2fb   : > { %1475 = vadd.xlane.f32.xlu2 %v1474_v28 }
 0x30a   : > { %v1458_v30 = vpop.xlane.xlu1 %1457 }
 0x30b   : > { %v1464_v31 = vsub.f32 %v1428_v19, %v1458_v30  ;;  %v2493_v30 = vld [vmem:[%s3204_s27] ss:$0 sm:$0xff] }
 0x30d   : > { %v1470_v33 = vmul.f32 1.442695, %v1464_v31 }
 0x30f   : > { %2504 = vpow2.f32 %v1470_v33 }
 0x310   : > { %2506 = vpow2.f32 %v1468_v34 }
 0x312   : > { %v1461_v35 = vpop.xlane.xlu1 %1460 }
 0x313   : > { %v1465_v36 = vsub.f32 %v1447_v21, %v1461_v35 }
 0x315   : > { %v2505_v37 = vpop.eup %2504  ;;  %v1472_v38 = vmul.f32 1.442695, %v1465_v36 }
 0x316   : > { %v1480_v39 = vsel %vm1373_vm6, %v2505_v37, 0.0  ;;  %v2507_v40 = vpop.eup %2506 }
 0x317   : > { %2508 = vpow2.f32 %v1472_v38  ;;  %1481 = vadd.xlane.f32.xlu0 %v1480_v39  ;;  %v1477_v43 = vsel %vm1373_vm6, %v2507_v40, 0.0 }
 0x31d   : > { %v2509_v41 = vpop.eup %2508 }
 0x31e   : > { %v1483_v42 = vsel %vm1373_vm6, %v2509_v41, 0.0 }
 0x31f   : > { %1484 = vadd.xlane.f32.xlu1 %v1483_v42  ;;  %1478 = vadd.xlane.f32.xlu0 %v1477_v43  ;;  %v2395_v42 = vld [vmem:[%s2873_s8 + $0x8] sm:$0xff]  ;;  %v2394_v43 = vld [vmem:[%s2873_s8] sm:$0xff] }
 0x36e   : > { %v1476_v44 = vpop.xlane.xlu2 %1475 }
 0x36f   : > { %2510 = vrcp.f32 %v1476_v44 }
 0x375   : > { %v2511_v45 = vpop.eup %2510 }
 0x376   : > { %v1490_v46 = vmul.f32 %v2511_v45, %v2503_v27 }
 0x378   : > { %v1494_v47 = vpack.c.bf16 %v1490_v46, %v1490_v46  ;;  %v2402_v46 = vld [vmem:[%s2882_s30 + $0x30] sm:$0xff] }
 0x37a   : > { %2301 = vmatmul.msk.bf16.vlgmr.msra.gmra.mxu0 %vm1373_vm6, %v1494_v47 }
 0x37b   : > { %1738 = vmatpush.bf16.msra.mxu0 %v2395_v42 }
 0x37f   : > { %1739 = vmatpush.bf16.msra.mxu0 %v2394_v43 }
 0x38a   : > { %v1482_v48 = vpop.xlane.xlu0 %1481 }
 0x38b   : > { %2512 = vrcp.f32 %v1482_v48 }
 0x391   : > { %v2513_v49 = vpop.eup %2512 }
 0x392   : > { %v1492_v50 = vmul.f32 %v2513_v49, %v2505_v37  ;;  %v1485_v51 = vpop.xlane.xlu1 %1484  ;;  %v1479_v52 = vpop.xlane.xlu0 %1478 }
 0x393   : > { %2514 = vrcp.f32 %v1485_v51 }
 0x394   : > { %v1496_v53 = vpack.c.bf16 %v1492_v50, %v1492_v50  ;;  %2516 = vrcp.f32 %v1479_v52 }
 0x396   : > { %2303 = vmatmul.msk.bf16.vlgmr.msrb.gmra.mxu2 %vm1373_vm6, %v1496_v53 }
 0x399   : > { %v2515_v54 = vpop.eup %2514 }
 0x39a   : > { %v2517_v55 = vpop.eup %2516  ;;  %v1493_v56 = vmul.f32 %v2515_v54, %v2509_v41  ;;  %v2494_v54 = vld [vmem:[%s3206_s2] ss:$0 sm:$0xff] }
 0x39b   : > { %v1491_v57 = vmul.f32 %v2517_v55, %v2507_v40 }
 0x39c   : > { %v1497_v58 = vpack.c.bf16 %v1493_v56, %v1493_v56 }
 0x39d   : > { %v1495_v59 = vpack.c.bf16 %v1491_v57, %v1491_v57  ;;  %v2495_v57 = vld [vmem:[%s889_s15] ss:$0 sm:$0xff] }
 0x39e   : > { %2304 = vmatmul.msk.bf16.vlgmr.msra.gmra.mxu3 %vm1373_vm6, %v1497_v58 }
 0x39f   : > { %2302 = vmatmul.msk.bf16.vlgmr.msrb.gmra.mxu1 %vm1373_vm6, %v1495_v59 }
 0x3f7   : > { %v1518_v62 = vpop.f32.mrf.mxu0 }
 0x3f8   : > { %v1579_v63 = vpack.c.bf16 %v1518_v62, %v1518_v62  ;;  %v2400_v62 = vld [vmem:[%s2882_s30 + $0x20] sm:$0xff] }
 0x3fa   : > { %2305 = vmatmul.msk.bf16.vlgmr.msrb.gmra.mxu0 %vm1373_vm6, %v1579_v63  ;;  %v2399_v63 = vld [vmem:[%s2882_s30 + $0x18] sm:$0xff] }
 0x3ff   : > { %v1520_v7 = vpop.f32.mrf.mxu0 }
 0x419   : > { %v1556_v8 = vpop.f32.mrf.mxu2 }
 0x41a   : > { %v1581_v10 = vpack.c.bf16 %v1556_v8, %v1556_v8 }
 0x41c   : > { %v1537_v11 = vpop.f32.mrf.mxu1  ;;  %2307 = vmatmul.msk.bf16.vlgmr.msra.gmra.mxu2 %vm1373_vm6, %v1581_v10 }
 0x41d   : > { %v1580_v12 = vpack.c.bf16 %v1537_v11, %v1537_v11 }
 0x41f   : > { %2306 = vmatmul.msk.bf16.vlgmr.msra.gmra.mxu1 %vm1373_vm6, %v1580_v12 }
 0x421   : > { %v1558_v13 = vpop.f32.mrf.mxu2  ;;  %v1575_v14 = vpop.f32.mrf.mxu3 }
 0x422   : > { %v1582_v15 = vpack.c.bf16 %v1575_v14, %v1575_v14 }
 0x424   : > { %v1539_v16 = vpop.f32.mrf.mxu1  ;;  %2308 = vmatmul.msk.bf16.vlgmr.msrb.gmra.mxu3 %vm1373_vm6, %v1582_v15 }
 0x429   : > { %v1577_v17 = vpop.f32.mrf.mxu3 }
 0x477   : > { %v1602_v18 = vpop.f32.mrf.mxu0 }
 0x478   : > { %v1663_v23 = vsel %vm917_vm1, %v1602_v18, 0.0 }
 0x47f   : > { %v1604_v19 = vpop.f32.mrf.mxu0 }
 0x480   : > { %v2497_v19 = vld [vmem:[%s905_s11] ss:$0 sm:$0xff] }
 0x49c   : > { %v1621_v20 = vpop.f32.mrf.mxu1 }
 0x49d   : > { %v1664_v22 = vsel %vm917_vm1, %v1621_v20, 0.0 }
 0x49e   : > { %v1665_v26 = vadd.f32 %v1664_v22, %v1663_v23 }
 0x49f   : > { %v1640_v21 = vpop.f32.mrf.mxu2 }
 0x4a0   : > { %v1666_v24 = vsel %vm917_vm1, %v1640_v21, 0.0 }
 0x4a1   : > { %v1667_v27 = vadd.f32 %v1666_v24, %v1665_v26 }
 0x4a4   : > { %v1623_v25 = vpop.f32.mrf.mxu1 }
 0x4a7   : > { %v1642_v28 = vpop.f32.mrf.mxu2  ;;  %v1659_v29 = vpop.f32.mrf.mxu3 }
 0x4a8   : > { %v1668_v31 = vsel %vm917_vm1, %v1659_v29, 0.0 }
 0x4a9   : > { %v1669_v32 = vadd.f32 %v1668_v31, %v1667_v27 }
 0x4ab   : > { %v1674_v33 = vadd.f32 %v2493_v30, %v1669_v32 }
 0x4ad   : > { %v3004_v34 = vadd.f32 %v1674_v33, %v2890_v1  ;;  %v2403_v1 = vld [vmem:[%s2882_s30 + $0x38] sm:$0xff] }
 0x4ae   : > { %1823 = vmatpush.bf16.msrb.mxu1 %v2403_v1 }
 0x4af   : > { %v1661_v35 = vpop.f32.mrf.mxu3  ;;  %v1678_v36 = vsel %vm917_vm1, %v3004_v34, 0.0 }
 0x4b0   : > { %1679 = vadd.xlane.f32.xlu1 %v1678_v36 }
 0x4b2   : > { %1824 = vmatpush.bf16.msrb.mxu1 %v2402_v46 }
 0x4b6   : > { %1825 = vmatpush.bf16.msrb.mxu1 %v2401_v61 }
 0x4ba   : > { %1826 = vmatpush.bf16.msrb.mxu1 %v2400_v62 }
 0x4be   : > { %1827 = vmatpush.bf16.msrb.mxu1 %v2399_v63 }
 0x4c2   : > { %1828 = vmatpush.bf16.msrb.mxu1 %v2398_v0 }
 0x4c6   : > { %1829 = vmatpush.bf16.msrb.mxu1 %v2397_v2 }
 0x4ca   : > { %1830 = vmatpush.bf16.msrb.mxu1 %v2396_v3 }
 0x523   : > { %v1680_v37 = vpop.xlane.xlu1 %1679 }
 0x524   : > { %v1681_v38 = vmul.f32 %v1680_v37, %v2894_v9 }
 0x526   : > { %v1682_v39 = vsub.f32 %v3004_v34, %v1681_v38 }
 0x528   : > { %v1683_v40 = vmul.f32 %v1682_v39, %v1682_v39 }
 0x52a   : > { %v1684_v41 = vsel %vm917_vm1, %v1683_v40, 0.0 }
 0x52b   : > { %1685 = vadd.xlane.f32.xlu2 %v1684_v41 }
 0x59e   : > { %v1686_v44 = vpop.xlane.xlu2 %1685 }
 0x59f   : > { %v1687_v45 = vmul.f32 %v1686_v44, %v2894_v9 }
 0x5a1   : > { %v1688_v47 = vadd.f32 1e-05, %v1687_v45 }
 0x5a3   : > { %2518 = vrsqrt.f32 %v1688_v47  ;;  %vm1695_vm10 = vweird.f32 %v1688_v47 }
 0x5a9   : > { %v2519_v48 = vpop.eup %2518 }
 0x5aa   : > { %v1690_v49 = vmul.f32 %v2519_v48, %v1688_v47  ;;  %vm1696_vm9 = vweird.f32 %v2519_v48 }
 0x5ab   : > { %vm1697_vm11 = vmor %vm1695_vm10, %vm1696_vm9 }
 0x5ac   : > { %v1691_v50 = vmul.f32 %v2519_v48, %v1690_v49 }
 0x5ae   : > { %v1692_v51 = vmul.f32 0.5, %v1691_v50 }
 0x5b0   : > { %v1693_v52 = vsub.f32 1.5, %v1692_v51 }
 0x5b2   : > { %v1694_v53 = vmul.f32 %v2519_v48, %v1693_v52 }
 0x5b4   : > { %v1698_v55 = vsel %vm1697_vm11, %v2519_v48, %v1694_v53 }
 0x5b5   : > { %v1699_v56 = vmul.f32 %v1698_v55, %v1682_v39 }
 0x5b7   : > { %v1703_v58 = vmul.f32 %v2494_v54, %v1699_v56 }
 0x5b9   : > { %v1707_v59 = vadd.f32 %v2495_v57, %v1703_v58 }
 0x5bb   : > { %v1712_v60 = vpack.c.bf16 %v1707_v59, %v1707_v59 }
 0x5bd   : > { %2317 = vmatmul.msk.bf16.vlgmr.msra.gmra.mxu0 %vm917_vm1, %v1712_v60 }
 0x63a   : > { %v1741_v5 = vpop.f32.mrf.mxu0 }
 0x63b   : > { %v1742_v6 = vadd.f32 %v2496_v4, %v1741_v5 }
 0x63d   : > { %v1746_v7 = vmul.f32 0.044715, %v1742_v6  ;;  %v1745_v15 = vmul.f32 0.5, %v1742_v6 }
 0x63f   : > { %v1747_v8 = vmul.f32 %v1746_v7, %v1742_v6 }
 0x641   : > { %v1748_v10 = vmul.f32 %v1747_v8, %v1742_v6 }
 0x642   : > { %v1743_v11 = vpop.f32.mrf.mxu0 }
 0x643   : > { %v1749_v12 = vadd.f32 %v1748_v10, %v1742_v6 }
 0x645   : > { %v1750_v13 = vmul.f32 0.7978846, %v1749_v12 }
 0x647   : > { %2520 = vtanh.f32 %v1750_v13 }
 0x64d   : > { %v2521_v14 = vpop.eup %2520 }
 0x64e   : > { %v1752_v16 = vadd.f32 1.0, %v2521_v14 }
 0x650   : > { %v1753_v17 = vmul.f32 %v1752_v16, %v1745_v15 }
 0x652   : > { %v1770_v18 = vpack.c.bf16 %v1753_v17, %v1753_v17 }
 0x654   : > { %1831 = vmatmul.bf16.vlgmr.msrb.gmra.mxu1 %v1770_v18 }
 0x6d1   : > { %v1832_v20 = vpop.f32.mrf.mxu1 }
 0x6d2   : > { %v1833_v21 = vadd.f32 %v2497_v19, %v1832_v20 }
 0x6d4   : > { %v1836_v22 = vadd.f32 %v1833_v21, %v3004_v34 }
 0x6d5   : > { %1841 = sbr.rel (%p2350_p1) target bundleno = 2162 (0x872), region = 108 }
 0x6d6   : > { %1837 = vst.msk [vmem:[#allocation2] sm:$0xff] %vm917_vm1, %v1836_v22 }
 0x6d9   : > { %v1834_v23 = vpop.f32.mrf.mxu1 }
 0x6da   : > { %v2405_v31 = vld [vmem:[%s3209_s20 + $0x8] sm:$0xff]  ;;  %v2404_v32 = vld [vmem:[%s3209_s20] sm:$0xff] }
 0x6db   : > { %1901 = vmatpush.bf16.msra.mxu0 %v2405_v31  ;;  %v2522_v42 = vld [vmem:[%s3210_s29] ss:$0 sm:$0xff] }
 0x6dd   : > { %v1842_v24 = vld [vmem:[#allocation2] sm:$0xff] }
 0x6de   : > { %v1845_v25 = vsel %vm917_vm1, %v1842_v24, 0.0 }
 0x6df   : > { %1846 = vadd.xlane.f32.xlu0 %v1845_v25  ;;  %1902 = vmatpush.bf16.msra.mxu0 %v2404_v32 }
 0x752   : > { %v1847_v26 = vpop.xlane.xlu0 %1846 }
 0x753   : > { %v1848_v27 = vmul.f32 %v1847_v26, %v2894_v9 }
 0x755   : > { %v1849_v28 = vsub.f32 %v1842_v24, %v1848_v27 }
 0x757   : > { %v1850_v29 = vmul.f32 %v1849_v28, %v1849_v28 }
 0x759   : > { %v1851_v30 = vsel %vm917_vm1, %v1850_v29, 0.0 }
 0x75a   : > { %1852 = vadd.xlane.f32.xlu0 %v1851_v30 }
 0x7cd   : > { %v1853_v33 = vpop.xlane.xlu0 %1852 }
 0x7ce   : > { %v1854_v34 = vmul.f32 %v1853_v33, %v2894_v9  ;;  %v2523_v9 = vld [vmem:[%s3211_s28] ss:$0 sm:$0xff] }
 0x7d0   : > { %v1855_v35 = vadd.f32 1e-05, %v1854_v34 }
 0x7d2   : > { %2524 = vrsqrt.f32 %v1855_v35  ;;  %vm1862_vm13 = vweird.f32 %v1855_v35 }
 0x7d8   : > { %v2525_v36 = vpop.eup %2524 }
 0x7d9   : > { %v1857_v37 = vmul.f32 %v2525_v36, %v1855_v35  ;;  %vm1863_vm12 = vweird.f32 %v2525_v36 }
 0x7da   : > { %vm1864_vm14 = vmor %vm1862_vm13, %vm1863_vm12 }
 0x7db   : > { %v1858_v38 = vmul.f32 %v2525_v36, %v1857_v37 }
 0x7dd   : > { %v1859_v39 = vmul.f32 0.5, %v1858_v38 }
 0x7df   : > { %v1860_v40 = vsub.f32 1.5, %v1859_v39 }
 0x7e1   : > { %v1861_v41 = vmul.f32 %v2525_v36, %v1860_v40 }
 0x7e3   : > { %v1865_v43 = vsel %vm1864_vm14, %v2525_v36, %v1861_v41 }
 0x7e4   : > { %v1866_v1 = vmul.f32 %v1865_v43, %v1849_v28 }
 0x7e6   : > { %v1870_v44 = vmul.f32 %v2522_v42, %v1866_v1 }
 0x7e8   : > { %v1874_v45 = vadd.f32 %v2523_v9, %v1870_v44 }
 0x7ea   : > { %v1879_v46 = vpack.c.bf16 %v1874_v45, %v1874_v45 }
 0x7ec   : > { %2359 = vmatmul.msk.bf16.vlgmr.msra.gmra.mxu0 %vm917_vm1, %v1879_v46 }
 0x869   : > { %v1904_v47 = vpop.f32.mrf.mxu0 }
 0x86a   : > { %1908 = vst [vmem:[%s838_s7] sm:$0xff] %v1904_v47 }
 0x871   : > { %v1906_v48 = vpop.f32.mrf.mxu0 }
 0x872 PF: > { %s3212_s24 = sld [smem:[#allocation10_spill]]  ;;  %s1922_s16 = sshll.u32 %s838_s7, 4  ;;  %s1923_s16 = int_to_ptr.vmem [resolvable:$true] %s1922_s16 }
 0x873   : > { %s3213_s27 = sld [smem:[#allocation7_spill]] }
 0x874   : > { %s3215_s6 = sld [smem:[#allocation37_spill]] }
 0x878   : > { %s2361_s26 = sshll.u32 %s3212_s24, 3 }
 0x879   : > { %s3216_s30 = sand.u32 1, %s3213_s27  }
 0x87a   : > { %s1920_s21 = scalar_lea.hbm %s3215_s6, %s2361_s26  ;;  %s1910_s17 = scalar_lea.sflag [#allocation4], %s3216_s30 }
 0x87b   : > { %s1924_s15 = sshll.u32 %s1920_s21, 4  ;;  %s2546_s4 = scalar_lea.hbm %s3215_s6, 16  ;;  %s1925_s15 = int_to_ptr.hbm [resolvable:$true] %s1924_s15 }
 0x87c   : > { %s2540_s18 = sshra.s32 %s1925_s15, 4  ;;  %s2541_s18 = int_to_ptr.hbm [resolvable:$true] %s2540_s18 }
 0x87d   : > { %s2542_s9 = scalar_lea.hbm %s2541_s18, 8  ;;  %p2547_p6 = scmp.lt.s32.totalorder %s2541_s18, %s3215_s6 }
 0x87e   : > { %p2543_p2 = scmp.ne.s32.totalorder %s2541_s18, %s2542_s9  ;;  %p2548_p7 = scmp.lt.s32.totalorder %s2546_s4, %s2542_s9 }
 0x880   : > { %p2544_p4 = pnand %p2543_p2, %p2778_p3  ;;  %p2549_p8 = por %p2548_p7, %p2547_p6 }
 0x882   : > { %p2545_p5 = pneg %p2544_p4 }
 0x884   : > { %p2550_p10 = pnand %p2549_p8, %p2545_p5 }
 0x886   : > { %2553 = shalt.err (!%p2550_p10)
}
 0x887   : > { %2406 = dma.vmem_to_hbm [thread:$0]  (%p2778_p3), %s1923_s16, 128, %s1925_s15, %s1910_s17  }
 0x888 PF: > { %s3217_s25 = sld [smem:[#allocation13_spill]] }
 0x889   : > { %s3218_s7 = sld [smem:[#allocation6_spill]] }
 0x88e   : > { %p2412_p11 = scmp.ge.s32.totalorder %s3217_s25, 2 }
 0x88f   : > { %s1936_s29 = sand.u32 1, %s3218_s7  }
 0x890   : > { %p2409_p12 = pnand %p2412_p11, %p2788_p9  ;;  %s1937_s23 = scalar_lea.sflag [#allocation4], %s1936_s29 }
 0x892   : > { %p2410_p13 = pneg %p2409_p12 }
 0x894   : > { %2587 = dma.done.wait (%p2410_p13), %s1937_s23, 128  }
 0x895   : > { %2589 = vsyncadd (%p2410_p13), %s1937_s23, 4294967168  ;;  %s33_s26 = sadd.s32 1, %s3217_s25   ;;  %s3220_s1 = sld [smem:[#allocation7_spill]] }
 0x896   : > { %p30_p0 = scmp.ge.s32.totalorder %s33_s26, 6   ;;  %s3221_s22 = sld [smem:[#allocation8_spill]] }
 0x897   : > { %s3222_s23 = sld [smem:[#allocation18_spill]] }
 0x898   : > { %s3223_s24 = sld [smem:[#allocation11_spill]]  ;;  %32 = sbr.rel (!%p30_p0) target bundleno = 23 (0x17), region = 191 }
 0x899   : > { %s3224_s2 = sld [smem:[#allocation12_spill]] }
 0x89a   : > { %s3225_s25 = sld [smem:[#allocation14_spill]] }
 0x89b   : > { %s3226_s3 = sld [smem:[#allocation16_spill]] }
 0x89d   :  { %1943 = vsyncpa [#allocation4], 1 }
 0x89e   :  { %1945 = vsyncpa [#allocation4 + $0x1], 1 }

</bundles_post_ra>
